<compile_context>
chip_gen: v6e
topology: v6e:2x2x1
jax: 0.10.0
libtpu: 0.0.40
codegen_flags: <defaults>
</compile_context>

<pallas_src>
import math
import functools

import jax
import jax.numpy as jnp
import numpy as np
from jax import lax
from jax.experimental import pallas as pl
from jax.experimental.pallas import tpu as pltpu

D_MODEL = 32
NHEAD = 4
HEAD_DIM = D_MODEL // NHEAD
DIM_FF = 64
L_TGT = 8      # target (decoder) sequence length
S_MEM = 12     # memory (encoder) sequence length
BATCH = 2
EPS = 1e-5     # nn.LayerNorm default


# ------------------------- packed parameter layout ---------------------------

def _param_layout(e, f):
    """Row layout of the single packed (rows, 128) parameter buffer."""
    assert 3 * e <= 128 and f <= 128
    layout = {}
    r = 0

    def add(name, nrows, ncols):
        nonlocal r
        layout[name] = (r, r + nrows, ncols)
        r += nrows

    add('w_qkv_sa', e, 3 * e)
    add('wo_sa', e, e)
    add('w_qkv_ca', e, 3 * e)
    add('wo_ca', e, e)
    add('w1', e, f)
    add('w2', f, e)
    for name, w in (('b_qkv_sa', 3 * e), ('bo_sa', e),
                    ('b_qkv_ca', 3 * e), ('bo_ca', e),
                    ('b1', f), ('b2', e),
                    ('ln1_g', e), ('ln1_b', e),
                    ('ln2_g', e), ('ln2_b', e),
                    ('ln3_g', e), ('ln3_b', e)):
        add(name, 1, w)
    nrows = ((r + 7) // 8) * 8
    return layout, nrows, 128


# ----------------------------- kernel helpers --------------------------------

def _layernorm(x, g, b):
    mu = jnp.mean(x, axis=-1, keepdims=True)
    var = jnp.mean((x - mu) ** 2, axis=-1, keepdims=True)
    return (x - mu) * lax.rsqrt(var + EPS) * g + b


def _mha(q_in, k_in, v_in, w_qkv, b_qkv, wo, bo, *, n_batch, lq, lk, shared_qk):
    """Multi-head attention on batch-flattened activations.

    One fused QKV matmul (row-stacked inputs x fused (E, 3E) weight), then a
    static per-(batch, head) loop: dot_general scores (no transpose), softmax
    with EUP reciprocal, AV, and per-head accumulation through the sliced
    output projection (no lane concatenate).  The 1/sqrt(head_dim) scale is
    already folded into the q columns of w_qkv / b_qkv.
    """
    e = wo.shape[0]
    hd = e // NHEAD
    nq = n_batch * lq
    nk = n_batch * lk

    if shared_qk:
        # self-attention: q and k share the same input rows
        stacked = jnp.concatenate([q_in, v_in], axis=0)            # (nq+nk, E)
    else:
        stacked = jnp.concatenate([q_in, k_in, v_in], axis=0)      # (nq+2nk, E)
    proj = jnp.dot(stacked, w_qkv, preferred_element_type=jnp.float32) + b_qkv

    if shared_qk:
        q = proj[0:nq, 0:e]
        k = proj[0:nq, e:2 * e]
        v = proj[nq:nq + nk, 2 * e:3 * e]
    else:
        q = proj[0:nq, 0:e]
        k = proj[nq:nq + nk, e:2 * e]
        v = proj[nq + nk:nq + 2 * nk, 2 * e:3 * e]

    outs = []
    for b in range(n_batch):                                 # static batch loop
        qb = q[b * lq:(b + 1) * lq]
        kb = k[b * lk:(b + 1) * lk]
        vb = v[b * lk:(b + 1) * lk]
        acc = jnp.zeros((lq, e), jnp.float32)
        for h in range(NHEAD):                               # static head loop
            lo, hi = h * hd, (h + 1) * hd
            s = lax.dot_general(qb[:, lo:hi], kb[:, lo:hi],
                                dimension_numbers=(((1,), (1,)), ((), ())),
                                preferred_element_type=jnp.float32)
            s = s - jnp.max(s, axis=-1, keepdims=True)
            p = jnp.exp(s)
            p = p * pl.reciprocal(jnp.sum(p, axis=-1, keepdims=True), approx=True)
            o = jnp.dot(p, vb[:, lo:hi], preferred_element_type=jnp.float32)
            acc = acc + jnp.dot(o, wo[lo:hi, :], preferred_element_type=jnp.float32)
        outs.append(acc)
    return jnp.concatenate(outs, axis=0) + bo


# --------------------------------- kernel ------------------------------------

def decoder_layer_kernel(act_ref, p_ref, out_ref, *, layout, n_batch, l_tgt, s_mem):
    nt = n_batch * l_tgt
    nm = n_batch * s_mem

    def pslice(name):
        lo, hi, w = layout[name]
        return p_ref[lo:hi, 0:w]

    x = act_ref[0:nt, :]                           # (B*L, E)
    tpos = act_ref[nt:2 * nt, :]                   # tgt_pos
    mem = act_ref[2 * nt:2 * nt + nm, :]           # memory
    memp = act_ref[2 * nt + nm:2 * nt + 2 * nm, :]  # memory + mem_pos

    # --- self-attention block: q = k = x + tgt_pos, v = x (dropout1 = id) ----
    qk = x + tpos
    sa = _mha(qk, qk, x,
              pslice('w_qkv_sa'), pslice('b_qkv_sa'),
              pslice('wo_sa'), pslice('bo_sa'),
              n_batch=n_batch, lq=l_tgt, lk=l_tgt, shared_qk=True)
    x = _layernorm(x + sa, pslice('ln1_g'), pslice('ln1_b'))

    # --- cross-attention: q = x + tgt_pos, k = mem + mem_pos, v = mem --------
    ca = _mha(x + tpos, memp, mem,
              pslice('w_qkv_ca'), pslice('b_qkv_ca'),
              pslice('wo_ca'), pslice('bo_ca'),
              n_batch=n_batch, lq=l_tgt, lk=s_mem, shared_qk=False)
    x = _layernorm(x + ca, pslice('ln2_g'), pslice('ln2_b'))

    # --- feed-forward: linear2(relu(linear1(x)))  (dropout = id) -------------
    h = jnp.maximum(
        jnp.dot(x, pslice('w1'), preferred_element_type=jnp.float32) + pslice('b1'),
        0.0)
    ff = jnp.dot(h, pslice('w2'), preferred_element_type=jnp.float32) + pslice('b2')
    x = _layernorm(x + ff, pslice('ln3_g'), pslice('ln3_b'))

    out_ref[...] = x
    # TODO(synk): attn_mask / key_padding_mask support (not exercised here).


# -------------------------------- wrapper -------------------------------------

def transformer_decoder_layer(tgt, memory, params, tgt_pos=None, mem_pos=None):
    """norm_first=False (post-norm) TransformerDecoderLayer forward."""
    L, B, E = tgt.shape
    S = memory.shape[0]
    F = params['lin1_w'].shape[0]
    layout, prow, pcol = _param_layout(E, F)
    scale = 1.0 / math.sqrt(E // NHEAD)

    def fused_qkv(in_w, in_b):
        # PyTorch in_proj weights are (3E, E) = rows [q; k; v], each (out, in).
        wq, wk, wv = in_w[:E], in_w[E:2 * E], in_w[2 * E:]
        bq, bk, bv = in_b[:E], in_b[E:2 * E], in_b[2 * E:]
        # transpose to (in, out), fuse along out, fold softmax scale into q.
        w = jnp.concatenate([wq.T * scale, wk.T, wv.T], axis=1)   # (E, 3E)
        b = jnp.concatenate([bq * scale, bk, bv])                 # (3E,)
        return w, b

    w_qkv_sa, b_qkv_sa = fused_qkv(params['sa_in_w'], params['sa_in_b'])
    w_qkv_ca, b_qkv_ca = fused_qkv(params['ca_in_w'], params['ca_in_b'])

    entries = {
        'w_qkv_sa': w_qkv_sa, 'wo_sa': params['sa_out_w'].T,
        'w_qkv_ca': w_qkv_ca, 'wo_ca': params['ca_out_w'].T,
        'w1': params['lin1_w'].T, 'w2': params['lin2_w'].T,
        'b_qkv_sa': b_qkv_sa.reshape(1, -1),
        'bo_sa': params['sa_out_b'].reshape(1, -1),
        'b_qkv_ca': b_qkv_ca.reshape(1, -1),
        'bo_ca': params['ca_out_b'].reshape(1, -1),
        'b1': params['lin1_b'].reshape(1, -1),
        'b2': params['lin2_b'].reshape(1, -1),
        'ln1_g': params['ln1_g'].reshape(1, -1), 'ln1_b': params['ln1_b'].reshape(1, -1),
        'ln2_g': params['ln2_g'].reshape(1, -1), 'ln2_b': params['ln2_b'].reshape(1, -1),
        'ln3_g': params['ln3_g'].reshape(1, -1), 'ln3_b': params['ln3_b'].reshape(1, -1),
    }
    pbuf = jnp.zeros((prow, pcol), jnp.float32)
    for name, arr in entries.items():
        lo, hi, w = layout[name]
        pbuf = pbuf.at[lo:hi, 0:w].set(arr.astype(jnp.float32))

    # batch-major, batch-flattened activations packed into one operand
    tgt_b = jnp.transpose(tgt, (1, 0, 2)).reshape(B * L, E)
    mem_b = jnp.transpose(memory, (1, 0, 2)).reshape(B * S, E)
    tpos_b = (jnp.zeros((B * L, E), jnp.float32) if tgt_pos is None
              else jnp.transpose(tgt_pos, (1, 0, 2)).reshape(B * L, E))
    mpos_b = (jnp.zeros((B * S, E), jnp.float32) if mem_pos is None
              else jnp.transpose(mem_pos, (1, 0, 2)).reshape(B * S, E))
    act = jnp.concatenate([tgt_b, tpos_b, mem_b, mem_b + mpos_b], axis=0)

    kernel = functools.partial(decoder_layer_kernel, layout=layout,
                               n_batch=B, l_tgt=L, s_mem=S)

    out = pl.pallas_call(
        kernel,
        out_shape=jax.ShapeDtypeStruct((B * L, E), jnp.float32),
        grid=(1,),
        in_specs=[pl.BlockSpec(act.shape, lambda i: (0, 0)),
                  pl.BlockSpec(pbuf.shape, lambda i: (0, 0))],
        out_specs=pl.BlockSpec((B * L, E), lambda i: (0, 0)),
        compiler_params=pltpu.CompilerParams(dimension_semantics=("arbitrary",)),
    )(act, pbuf)

    return jnp.transpose(out.reshape(B, L, E), (1, 0, 2))


# ----------------------- deterministic parameter init ------------------------

def init_params(key):
    ks = jax.random.split(key, 18)

    def w(k, shape, scale=0.1):
        return jax.random.normal(k, shape, jnp.float32) * scale

    return {
        'sa_in_w': w(ks[0], (3 * D_MODEL, D_MODEL)),
        'sa_in_b': w(ks[1], (3 * D_MODEL,)),
        'sa_out_w': w(ks[2], (D_MODEL, D_MODEL)),
        'sa_out_b': w(ks[3], (D_MODEL,)),
        'ca_in_w': w(ks[4], (3 * D_MODEL, D_MODEL)),
        'ca_in_b': w(ks[5], (3 * D_MODEL,)),
        'ca_out_w': w(ks[6], (D_MODEL, D_MODEL)),
        'ca_out_b': w(ks[7], (D_MODEL,)),
        'lin1_w': w(ks[8], (DIM_FF, D_MODEL)),
        'lin1_b': w(ks[9], (DIM_FF,)),
        'lin2_w': w(ks[10], (D_MODEL, DIM_FF)),
        'lin2_b': w(ks[11], (D_MODEL,)),
        'ln1_g': 1.0 + w(ks[12], (D_MODEL,)),
        'ln1_b': w(ks[13], (D_MODEL,)),
        'ln2_g': 1.0 + w(ks[14], (D_MODEL,)),
        'ln2_b': w(ks[15], (D_MODEL,)),
        'ln3_g': 1.0 + w(ks[16], (D_MODEL,)),
        'ln3_b': w(ks[17], (D_MODEL,)),
    }


# ----------------------------- pure-JAX reference ----------------------------

def reference(tgt, memory, p, tgt_pos=None, mem_pos=None):
    E = D_MODEL
    tpos = jnp.zeros_like(tgt) if tgt_pos is None else tgt_pos
    mpos = jnp.zeros_like(memory) if mem_pos is None else mem_pos

    def mha(q_in, k_in, v_in, in_w, in_b, out_w, out_b):
        wq, wk, wv = in_w[:E], in_w[E:2 * E], in_w[2 * E:]
        bq, bk, bv = in_b[:E], in_b[E:2 * E], in_b[2 * E:]
        q = q_in @ wq.T + bq
        k = k_in @ wk.T + bk
        v = v_in @ wv.T + bv
        L, B, _ = q.shape
        S = k.shape[0]
        qh = q.reshape(L, B, NHEAD, HEAD_DIM).transpose(1, 2, 0, 3)
        kh = k.reshape(S, B, NHEAD, HEAD_DIM).transpose(1, 2, 0, 3)
        vh = v.reshape(S, B, NHEAD, HEAD_DIM).transpose(1, 2, 0, 3)
        s = jnp.einsum('bhld,bhsd->bhls', qh, kh) / math.sqrt(HEAD_DIM)
        a = jax.nn.softmax(s, axis=-1)
        o = jnp.einsum('bhls,bhsd->bhld', a, vh)
        o = o.transpose(2, 0, 1, 3).reshape(L, B, E)
        return o @ out_w.T + out_b

    def ln(x, g, b):
        mu = jnp.mean(x, axis=-1, keepdims=True)
        var = jnp.mean((x - mu) ** 2, axis=-1, keepdims=True)
        return (x - mu) / jnp.sqrt(var + EPS) * g + b

    x = tgt
    qk = x + tpos
    sa = mha(qk, qk, x, p['sa_in_w'], p['sa_in_b'], p['sa_out_w'], p['sa_out_b'])
    x = ln(x + sa, p['ln1_g'], p['ln1_b'])
    ca = mha(x + tpos, memory + mpos, memory,
             p['ca_in_w'], p['ca_in_b'], p['ca_out_w'], p['ca_out_b'])
    x = ln(x + ca, p['ln2_g'], p['ln2_b'])
    h = jax.nn.relu(x @ p['lin1_w'].T + p['lin1_b'])
    ff = h @ p['lin2_w'].T + p['lin2_b']
    x = ln(x + ff, p['ln3_g'], p['ln3_b'])
    return x


# ----------------------------------- main -------------------------------------

if __name__ == "__main__":
    key = jax.random.PRNGKey(0)
    kt, km, kp = jax.random.split(key, 3)
    tgt = jax.random.normal(kt, (L_TGT, BATCH, D_MODEL), jnp.float32)
    memory = jax.random.normal(km, (S_MEM, BATCH, D_MODEL), jnp.float32)
    params = init_params(kp)

    out = transformer_decoder_layer(tgt, memory, params)
    out = jax.block_until_ready(out)

    ref = reference(tgt, memory, params)
    # tolerance relaxed vs. 1e-4 because the softmax denominator uses the
    # EUP approximate reciprocal (pl.reciprocal(..., approx=True)).
    np.testing.assert_allclose(np.asarray(out), np.asarray(ref), rtol=5e-3, atol=5e-3)
    print("KERNEL_OK")
</pallas_src>

<mosaic_0001>
module attributes {stable_mosaic.version = 11 : i64} {
  func.func @decoder_layer_kernel(%arg0: i32, %arg1: memref<80x32xf32, #tpu.memory_space<vmem>>, %arg2: memref<240x128xf32, #tpu.memory_space<vmem>>, %arg3: memref<16x32xf32, #tpu.memory_space<vmem>>) attributes {dimension_semantics = [#tpu.dimension_semantics<arbitrary>], iteration_bounds = array<i64: 1>, scalar_prefetch = 0 : i64, scratch_operands = 0 : i64, tpu.core_type = #tpu.core_type<tc>, window_params = [{pipeline_mode = #tpu.pipeline_mode<synchronous>, transform_indices = @transform_0, window_bounds = array<i64: 80, 32>}, {pipeline_mode = #tpu.pipeline_mode<synchronous>, transform_indices = @transform_1, window_bounds = array<i64: 240, 128>}, {pipeline_mode = #tpu.pipeline_mode<synchronous>, transform_indices = @transform_2, window_bounds = array<i64: 16, 32>}]} {
    %c0 = arith.constant 0 : index
    %c0_0 = arith.constant 0 : index
    %0 = vector.load %arg1[%c0, %c0_0] : memref<80x32xf32, #tpu.memory_space<vmem>>, vector<16x32xf32>
    %c16 = arith.constant 16 : index
    %c0_1 = arith.constant 0 : index
    %1 = vector.load %arg1[%c16, %c0_1] : memref<80x32xf32, #tpu.memory_space<vmem>>, vector<16x32xf32>
    %c32 = arith.constant 32 : index
    %c0_2 = arith.constant 0 : index
    %2 = vector.load %arg1[%c32, %c0_2] : memref<80x32xf32, #tpu.memory_space<vmem>>, vector<24x32xf32>
    %c56 = arith.constant 56 : index
    %c0_3 = arith.constant 0 : index
    %3 = vector.load %arg1[%c56, %c0_3] : memref<80x32xf32, #tpu.memory_space<vmem>>, vector<24x32xf32>
    %4 = arith.addf %0, %1 : vector<16x32xf32>
    %c0_4 = arith.constant 0 : index
    %c0_5 = arith.constant 0 : index
    %5 = vector.load %arg2[%c0_4, %c0_5] : memref<240x128xf32, #tpu.memory_space<vmem>>, vector<32x96xf32>
    %c224 = arith.constant 224 : index
    %c0_6 = arith.constant 0 : index
    %6 = vector.load %arg2[%c224, %c0_6] : memref<240x128xf32, #tpu.memory_space<vmem>>, vector<1x96xf32>
    %c32_7 = arith.constant 32 : index
    %c0_8 = arith.constant 0 : index
    %7 = vector.load %arg2[%c32_7, %c0_8] : memref<240x128xf32, #tpu.memory_space<vmem>>, vector<32x32xf32>
    %c225 = arith.constant 225 : index
    %c0_9 = arith.constant 0 : index
    %8 = vector.load %arg2[%c225, %c0_9] : memref<240x128xf32, #tpu.memory_space<vmem>>, vector<1x32xf32>
    %9 = tpu.concatenate %4, %0 in 0 : vector<16x32xf32>, vector<16x32xf32> -> vector<32x32xf32>
    %cst = arith.constant dense<0.000000e+00> : vector<32x96xf32>
    %10 = tpu.matmul %9, %5, %cst {dimension_numbers = #tpu.dot_dimension_numbers<[1], [0], [0], [1], [0, 0, 1, 1], [], []>} : vector<32x32xf32>, vector<32x96xf32>, vector<32x96xf32> -> vector<32x96xf32>
    %11 = vector.broadcast %6 : vector<1x96xf32> to vector<32x96xf32>
    %12 = arith.addf %10, %11 : vector<32x96xf32>
    %13 = vector.extract_strided_slice %12 {offsets = [0, 0], sizes = [16, 32], strides = [1, 1]} : vector<32x96xf32> to vector<16x32xf32>
    %14 = vector.extract_strided_slice %12 {offsets = [0, 32], sizes = [16, 32], strides = [1, 1]} : vector<32x96xf32> to vector<16x32xf32>
    %15 = vector.extract_strided_slice %12 {offsets = [16, 64], sizes = [16, 32], strides = [1, 1]} : vector<32x96xf32> to vector<16x32xf32>
    %16 = vector.extract_strided_slice %13 {offsets = [0, 0], sizes = [8, 32], strides = [1, 1]} : vector<16x32xf32> to vector<8x32xf32>
    %17 = vector.extract_strided_slice %14 {offsets = [0, 0], sizes = [8, 32], strides = [1, 1]} : vector<16x32xf32> to vector<8x32xf32>
    %18 = vector.extract_strided_slice %15 {offsets = [0, 0], sizes = [8, 32], strides = [1, 1]} : vector<16x32xf32> to vector<8x32xf32>
    %cst_10 = arith.constant 0.000000e+00 : f32
    %19 = vector.broadcast %cst_10 : f32 to vector<8x32xf32>
    %20 = vector.extract_strided_slice %16 {offsets = [0, 0], sizes = [8, 8], strides = [1, 1]} : vector<8x32xf32> to vector<8x8xf32>
    %21 = vector.extract_strided_slice %17 {offsets = [0, 0], sizes = [8, 8], strides = [1, 1]} : vector<8x32xf32> to vector<8x8xf32>
    %cst_11 = arith.constant dense<0.000000e+00> : vector<8x8xf32>
    %22 = tpu.matmul %20, %21, %cst_11 {dimension_numbers = #tpu.dot_dimension_numbers<[1], [1], [0], [0], [0, 0, 1, 0], [], []>} : vector<8x8xf32>, vector<8x8xf32>, vector<8x8xf32> -> vector<8x8xf32>
    %cst_12 = arith.constant dense<0xFF800000> : vector<8xf32>
    %23 = vector.multi_reduction <maximumf>, %22, %cst_12 [1] : vector<8x8xf32> to vector<8xf32>
    %24 = vector.shape_cast %23 : vector<8xf32> to vector<8x1xf32>
    %25 = vector.broadcast %24 : vector<8x1xf32> to vector<8x8xf32>
    %26 = arith.subf %22, %25 : vector<8x8xf32>
    %27 = math.exp %26 : vector<8x8xf32>
    %cst_13 = arith.constant dense<0.000000e+00> : vector<8xf32>
    %28 = vector.multi_reduction <add>, %27, %cst_13 [1] : vector<8x8xf32> to vector<8xf32>
    %29 = vector.shape_cast %28 : vector<8xf32> to vector<8x1xf32>
    %30 = tpu.reciprocal %29 {approx = true} : vector<8x1xf32> -> vector<8x1xf32>
    %31 = vector.broadcast %30 : vector<8x1xf32> to vector<8x8xf32>
    %32 = arith.mulf %27, %31 : vector<8x8xf32>
    %33 = vector.extract_strided_slice %18 {offsets = [0, 0], sizes = [8, 8], strides = [1, 1]} : vector<8x32xf32> to vector<8x8xf32>
    %cst_14 = arith.constant dense<0.000000e+00> : vector<8x8xf32>
    %34 = tpu.matmul %32, %33, %cst_14 {dimension_numbers = #tpu.dot_dimension_numbers<[1], [0], [0], [1], [0, 0, 1, 1], [], []>} : vector<8x8xf32>, vector<8x8xf32>, vector<8x8xf32> -> vector<8x8xf32>
    %35 = vector.extract_strided_slice %7 {offsets = [0, 0], sizes = [8, 32], strides = [1, 1]} : vector<32x32xf32> to vector<8x32xf32>
    %cst_15 = arith.constant dense<0.000000e+00> : vector<8x32xf32>
    %36 = tpu.matmul %34, %35, %cst_15 {dimension_numbers = #tpu.dot_dimension_numbers<[1], [0], [0], [1], [0, 0, 1, 1], [], []>} : vector<8x8xf32>, vector<8x32xf32>, vector<8x32xf32> -> vector<8x32xf32>
    %37 = arith.addf %19, %36 : vector<8x32xf32>
    %38 = vector.extract_strided_slice %16 {offsets = [0, 8], sizes = [8, 8], strides = [1, 1]} : vector<8x32xf32> to vector<8x8xf32>
    %39 = vector.extract_strided_slice %17 {offsets = [0, 8], sizes = [8, 8], strides = [1, 1]} : vector<8x32xf32> to vector<8x8xf32>
    %cst_16 = arith.constant dense<0.000000e+00> : vector<8x8xf32>
    %40 = tpu.matmul %38, %39, %cst_16 {dimension_numbers = #tpu.dot_dimension_numbers<[1], [1], [0], [0], [0, 0, 1, 0], [], []>} : vector<8x8xf32>, vector<8x8xf32>, vector<8x8xf32> -> vector<8x8xf32>
    %cst_17 = arith.constant dense<0xFF800000> : vector<8xf32>
    %41 = vector.multi_reduction <maximumf>, %40, %cst_17 [1] : vector<8x8xf32> to vector<8xf32>
    %42 = vector.shape_cast %41 : vector<8xf32> to vector<8x1xf32>
    %43 = vector.broadcast %42 : vector<8x1xf32> to vector<8x8xf32>
    %44 = arith.subf %40, %43 : vector<8x8xf32>
    %45 = math.exp %44 : vector<8x8xf32>
    %cst_18 = arith.constant dense<0.000000e+00> : vector<8xf32>
    %46 = vector.multi_reduction <add>, %45, %cst_18 [1] : vector<8x8xf32> to vector<8xf32>
    %47 = vector.shape_cast %46 : vector<8xf32> to vector<8x1xf32>
    %48 = tpu.reciprocal %47 {approx = true} : vector<8x1xf32> -> vector<8x1xf32>
    %49 = vector.broadcast %48 : vector<8x1xf32> to vector<8x8xf32>
    %50 = arith.mulf %45, %49 : vector<8x8xf32>
    %51 = vector.extract_strided_slice %18 {offsets = [0, 8], sizes = [8, 8], strides = [1, 1]} : vector<8x32xf32> to vector<8x8xf32>
    %cst_19 = arith.constant dense<0.000000e+00> : vector<8x8xf32>
    %52 = tpu.matmul %50, %51, %cst_19 {dimension_numbers = #tpu.dot_dimension_numbers<[1], [0], [0], [1], [0, 0, 1, 1], [], []>} : vector<8x8xf32>, vector<8x8xf32>, vector<8x8xf32> -> vector<8x8xf32>
    %53 = vector.extract_strided_slice %7 {offsets = [8, 0], sizes = [8, 32], strides = [1, 1]} : vector<32x32xf32> to vector<8x32xf32>
    %cst_20 = arith.constant dense<0.000000e+00> : vector<8x32xf32>
    %54 = tpu.matmul %52, %53, %cst_20 {dimension_numbers = #tpu.dot_dimension_numbers<[1], [0], [0], [1], [0, 0, 1, 1], [], []>} : vector<8x8xf32>, vector<8x32xf32>, vector<8x32xf32> -> vector<8x32xf32>
    %55 = arith.addf %37, %54 : vector<8x32xf32>
    %56 = vector.extract_strided_slice %16 {offsets = [0, 16], sizes = [8, 8], strides = [1, 1]} : vector<8x32xf32> to vector<8x8xf32>
    %57 = vector.extract_strided_slice %17 {offsets = [0, 16], sizes = [8, 8], strides = [1, 1]} : vector<8x32xf32> to vector<8x8xf32>
    %cst_21 = arith.constant dense<0.000000e+00> : vector<8x8xf32>
    %58 = tpu.matmul %56, %57, %cst_21 {dimension_numbers = #tpu.dot_dimension_numbers<[1], [1], [0], [0], [0, 0, 1, 0], [], []>} : vector<8x8xf32>, vector<8x8xf32>, vector<8x8xf32> -> vector<8x8xf32>
    %cst_22 = arith.constant dense<0xFF800000> : vector<8xf32>
    %59 = vector.multi_reduction <maximumf>, %58, %cst_22 [1] : vector<8x8xf32> to vector<8xf32>
    %60 = vector.shape_cast %59 : vector<8xf32> to vector<8x1xf32>
    %61 = vector.broadcast %60 : vector<8x1xf32> to vector<8x8xf32>
    %62 = arith.subf %58, %61 : vector<8x8xf32>
    %63 = math.exp %62 : vector<8x8xf32>
    %cst_23 = arith.constant dense<0.000000e+00> : vector<8xf32>
    %64 = vector.multi_reduction <add>, %63, %cst_23 [1] : vector<8x8xf32> to vector<8xf32>
    %65 = vector.shape_cast %64 : vector<8xf32> to vector<8x1xf32>
    %66 = tpu.reciprocal %65 {approx = true} : vector<8x1xf32> -> vector<8x1xf32>
    %67 = vector.broadcast %66 : vector<8x1xf32> to vector<8x8xf32>
    %68 = arith.mulf %63, %67 : vector<8x8xf32>
    %69 = vector.extract_strided_slice %18 {offsets = [0, 16], sizes = [8, 8], strides = [1, 1]} : vector<8x32xf32> to vector<8x8xf32>
    %cst_24 = arith.constant dense<0.000000e+00> : vector<8x8xf32>
    %70 = tpu.matmul %68, %69, %cst_24 {dimension_numbers = #tpu.dot_dimension_numbers<[1], [0], [0], [1], [0, 0, 1, 1], [], []>} : vector<8x8xf32>, vector<8x8xf32>, vector<8x8xf32> -> vector<8x8xf32>
    %71 = vector.extract_strided_slice %7 {offsets = [16, 0], sizes = [8, 32], strides = [1, 1]} : vector<32x32xf32> to vector<8x32xf32>
    %cst_25 = arith.constant dense<0.000000e+00> : vector<8x32xf32>
    %72 = tpu.matmul %70, %71, %cst_25 {dimension_numbers = #tpu.dot_dimension_numbers<[1], [0], [0], [1], [0, 0, 1, 1], [], []>} : vector<8x8xf32>, vector<8x32xf32>, vector<8x32xf32> -> vector<8x32xf32>
    %73 = arith.addf %55, %72 : vector<8x32xf32>
    %74 = vector.extract_strided_slice %16 {offsets = [0, 24], sizes = [8, 8], strides = [1, 1]} : vector<8x32xf32> to vector<8x8xf32>
    %75 = vector.extract_strided_slice %17 {offsets = [0, 24], sizes = [8, 8], strides = [1, 1]} : vector<8x32xf32> to vector<8x8xf32>
    %cst_26 = arith.constant dense<0.000000e+00> : vector<8x8xf32>
    %76 = tpu.matmul %74, %75, %cst_26 {dimension_numbers = #tpu.dot_dimension_numbers<[1], [1], [0], [0], [0, 0, 1, 0], [], []>} : vector<8x8xf32>, vector<8x8xf32>, vector<8x8xf32> -> vector<8x8xf32>
    %cst_27 = arith.constant dense<0xFF800000> : vector<8xf32>
    %77 = vector.multi_reduction <maximumf>, %76, %cst_27 [1] : vector<8x8xf32> to vector<8xf32>
    %78 = vector.shape_cast %77 : vector<8xf32> to vector<8x1xf32>
    %79 = vector.broadcast %78 : vector<8x1xf32> to vector<8x8xf32>
    %80 = arith.subf %76, %79 : vector<8x8xf32>
    %81 = math.exp %80 : vector<8x8xf32>
    %cst_28 = arith.constant dense<0.000000e+00> : vector<8xf32>
    %82 = vector.multi_reduction <add>, %81, %cst_28 [1] : vector<8x8xf32> to vector<8xf32>
    %83 = vector.shape_cast %82 : vector<8xf32> to vector<8x1xf32>
    %84 = tpu.reciprocal %83 {approx = true} : vector<8x1xf32> -> vector<8x1xf32>
    %85 = vector.broadcast %84 : vector<8x1xf32> to vector<8x8xf32>
    %86 = arith.mulf %81, %85 : vector<8x8xf32>
    %87 = vector.extract_strided_slice %18 {offsets = [0, 24], sizes = [8, 8], strides = [1, 1]} : vector<8x32xf32> to vector<8x8xf32>
    %cst_29 = arith.constant dense<0.000000e+00> : vector<8x8xf32>
    %88 = tpu.matmul %86, %87, %cst_29 {dimension_numbers = #tpu.dot_dimension_numbers<[1], [0], [0], [1], [0, 0, 1, 1], [], []>} : vector<8x8xf32>, vector<8x8xf32>, vector<8x8xf32> -> vector<8x8xf32>
    %89 = vector.extract_strided_slice %7 {offsets = [24, 0], sizes = [8, 32], strides = [1, 1]} : vector<32x32xf32> to vector<8x32xf32>
    %cst_30 = arith.constant dense<0.000000e+00> : vector<8x32xf32>
    %90 = tpu.matmul %88, %89, %cst_30 {dimension_numbers = #tpu.dot_dimension_numbers<[1], [0], [0], [1], [0, 0, 1, 1], [], []>} : vector<8x8xf32>, vector<8x32xf32>, vector<8x32xf32> -> vector<8x32xf32>
    %91 = arith.addf %73, %90 : vector<8x32xf32>
    %92 = vector.extract_strided_slice %13 {offsets = [8, 0], sizes = [8, 32], strides = [1, 1]} : vector<16x32xf32> to vector<8x32xf32>
    %93 = vector.extract_strided_slice %14 {offsets = [8, 0], sizes = [8, 32], strides = [1, 1]} : vector<16x32xf32> to vector<8x32xf32>
    %94 = vector.extract_strided_slice %15 {offsets = [8, 0], sizes = [8, 32], strides = [1, 1]} : vector<16x32xf32> to vector<8x32xf32>
    %cst_31 = arith.constant 0.000000e+00 : f32
    %95 = vector.broadcast %cst_31 : f32 to vector<8x32xf32>
    %96 = vector.extract_strided_slice %92 {offsets = [0, 0], sizes = [8, 8], strides = [1, 1]} : vector<8x32xf32> to vector<8x8xf32>
    %97 = vector.extract_strided_slice %93 {offsets = [0, 0], sizes = [8, 8], strides = [1, 1]} : vector<8x32xf32> to vector<8x8xf32>
    %cst_32 = arith.constant dense<0.000000e+00> : vector<8x8xf32>
    %98 = tpu.matmul %96, %97, %cst_32 {dimension_numbers = #tpu.dot_dimension_numbers<[1], [1], [0], [0], [0, 0, 1, 0], [], []>} : vector<8x8xf32>, vector<8x8xf32>, vector<8x8xf32> -> vector<8x8xf32>
    %cst_33 = arith.constant dense<0xFF800000> : vector<8xf32>
    %99 = vector.multi_reduction <maximumf>, %98, %cst_33 [1] : vector<8x8xf32> to vector<8xf32>
    %100 = vector.shape_cast %99 : vector<8xf32> to vector<8x1xf32>
    %101 = vector.broadcast %100 : vector<8x1xf32> to vector<8x8xf32>
    %102 = arith.subf %98, %101 : vector<8x8xf32>
    %103 = math.exp %102 : vector<8x8xf32>
    %cst_34 = arith.constant dense<0.000000e+00> : vector<8xf32>
    %104 = vector.multi_reduction <add>, %103, %cst_34 [1] : vector<8x8xf32> to vector<8xf32>
    %105 = vector.shape_cast %104 : vector<8xf32> to vector<8x1xf32>
    %106 = tpu.reciprocal %105 {approx = true} : vector<8x1xf32> -> vector<8x1xf32>
    %107 = vector.broadcast %106 : vector<8x1xf32> to vector<8x8xf32>
    %108 = arith.mulf %103, %107 : vector<8x8xf32>
    %109 = vector.extract_strided_slice %94 {offsets = [0, 0], sizes = [8, 8], strides = [1, 1]} : vector<8x32xf32> to vector<8x8xf32>
    %cst_35 = arith.constant dense<0.000000e+00> : vector<8x8xf32>
    %110 = tpu.matmul %108, %109, %cst_35 {dimension_numbers = #tpu.dot_dimension_numbers<[1], [0], [0], [1], [0, 0, 1, 1], [], []>} : vector<8x8xf32>, vector<8x8xf32>, vector<8x8xf32> -> vector<8x8xf32>
    %111 = vector.extract_strided_slice %7 {offsets = [0, 0], sizes = [8, 32], strides = [1, 1]} : vector<32x32xf32> to vector<8x32xf32>
    %cst_36 = arith.constant dense<0.000000e+00> : vector<8x32xf32>
    %112 = tpu.matmul %110, %111, %cst_36 {dimension_numbers = #tpu.dot_dimension_numbers<[1], [0], [0], [1], [0, 0, 1, 1], [], []>} : vector<8x8xf32>, vector<8x32xf32>, vector<8x32xf32> -> vector<8x32xf32>
    %113 = arith.addf %95, %112 : vector<8x32xf32>
    %114 = vector.extract_strided_slice %92 {offsets = [0, 8], sizes = [8, 8], strides = [1, 1]} : vector<8x32xf32> to vector<8x8xf32>
    %115 = vector.extract_strided_slice %93 {offsets = [0, 8], sizes = [8, 8], strides = [1, 1]} : vector<8x32xf32> to vector<8x8xf32>
    %cst_37 = arith.constant dense<0.000000e+00> : vector<8x8xf32>
    %116 = tpu.matmul %114, %115, %cst_37 {dimension_numbers = #tpu.dot_dimension_numbers<[1], [1], [0], [0], [0, 0, 1, 0], [], []>} : vector<8x8xf32>, vector<8x8xf32>, vector<8x8xf32> -> vector<8x8xf32>
    %cst_38 = arith.constant dense<0xFF800000> : vector<8xf32>
    %117 = vector.multi_reduction <maximumf>, %116, %cst_38 [1] : vector<8x8xf32> to vector<8xf32>
    %118 = vector.shape_cast %117 : vector<8xf32> to vector<8x1xf32>
    %119 = vector.broadcast %118 : vector<8x1xf32> to vector<8x8xf32>
    %120 = arith.subf %116, %119 : vector<8x8xf32>
    %121 = math.exp %120 : vector<8x8xf32>
    %cst_39 = arith.constant dense<0.000000e+00> : vector<8xf32>
    %122 = vector.multi_reduction <add>, %121, %cst_39 [1] : vector<8x8xf32> to vector<8xf32>
    %123 = vector.shape_cast %122 : vector<8xf32> to vector<8x1xf32>
    %124 = tpu.reciprocal %123 {approx = true} : vector<8x1xf32> -> vector<8x1xf32>
    %125 = vector.broadcast %124 : vector<8x1xf32> to vector<8x8xf32>
    %126 = arith.mulf %121, %125 : vector<8x8xf32>
    %127 = vector.extract_strided_slice %94 {offsets = [0, 8], sizes = [8, 8], strides = [1, 1]} : vector<8x32xf32> to vector<8x8xf32>
    %cst_40 = arith.constant dense<0.000000e+00> : vector<8x8xf32>
    %128 = tpu.matmul %126, %127, %cst_40 {dimension_numbers = #tpu.dot_dimension_numbers<[1], [0], [0], [1], [0, 0, 1, 1], [], []>} : vector<8x8xf32>, vector<8x8xf32>, vector<8x8xf32> -> vector<8x8xf32>
    %129 = vector.extract_strided_slice %7 {offsets = [8, 0], sizes = [8, 32], strides = [1, 1]} : vector<32x32xf32> to vector<8x32xf32>
    %cst_41 = arith.constant dense<0.000000e+00> : vector<8x32xf32>
    %130 = tpu.matmul %128, %129, %cst_41 {dimension_numbers = #tpu.dot_dimension_numbers<[1], [0], [0], [1], [0, 0, 1, 1], [], []>} : vector<8x8xf32>, vector<8x32xf32>, vector<8x32xf32> -> vector<8x32xf32>
    %131 = arith.addf %113, %130 : vector<8x32xf32>
    %132 = vector.extract_strided_slice %92 {offsets = [0, 16], sizes = [8, 8], strides = [1, 1]} : vector<8x32xf32> to vector<8x8xf32>
    %133 = vector.extract_strided_slice %93 {offsets = [0, 16], sizes = [8, 8], strides = [1, 1]} : vector<8x32xf32> to vector<8x8xf32>
    %cst_42 = arith.constant dense<0.000000e+00> : vector<8x8xf32>
    %134 = tpu.matmul %132, %133, %cst_42 {dimension_numbers = #tpu.dot_dimension_numbers<[1], [1], [0], [0], [0, 0, 1, 0], [], []>} : vector<8x8xf32>, vector<8x8xf32>, vector<8x8xf32> -> vector<8x8xf32>
    %cst_43 = arith.constant dense<0xFF800000> : vector<8xf32>
    %135 = vector.multi_reduction <maximumf>, %134, %cst_43 [1] : vector<8x8xf32> to vector<8xf32>
    %136 = vector.shape_cast %135 : vector<8xf32> to vector<8x1xf32>
    %137 = vector.broadcast %136 : vector<8x1xf32> to vector<8x8xf32>
    %138 = arith.subf %134, %137 : vector<8x8xf32>
    %139 = math.exp %138 : vector<8x8xf32>
    %cst_44 = arith.constant dense<0.000000e+00> : vector<8xf32>
    %140 = vector.multi_reduction <add>, %139, %cst_44 [1] : vector<8x8xf32> to vector<8xf32>
    %141 = vector.shape_cast %140 : vector<8xf32> to vector<8x1xf32>
    %142 = tpu.reciprocal %141 {approx = true} : vector<8x1xf32> -> vector<8x1xf32>
    %143 = vector.broadcast %142 : vector<8x1xf32> to vector<8x8xf32>
    %144 = arith.mulf %139, %143 : vector<8x8xf32>
    %145 = vector.extract_strided_slice %94 {offsets = [0, 16], sizes = [8, 8], strides = [1, 1]} : vector<8x32xf32> to vector<8x8xf32>
    %cst_45 = arith.constant dense<0.000000e+00> : vector<8x8xf32>
    %146 = tpu.matmul %144, %145, %cst_45 {dimension_numbers = #tpu.dot_dimension_numbers<[1], [0], [0], [1], [0, 0, 1, 1], [], []>} : vector<8x8xf32>, vector<8x8xf32>, vector<8x8xf32> -> vector<8x8xf32>
    %147 = vector.extract_strided_slice %7 {offsets = [16, 0], sizes = [8, 32], strides = [1, 1]} : vector<32x32xf32> to vector<8x32xf32>
    %cst_46 = arith.constant dense<0.000000e+00> : vector<8x32xf32>
    %148 = tpu.matmul %146, %147, %cst_46 {dimension_numbers = #tpu.dot_dimension_numbers<[1], [0], [0], [1], [0, 0, 1, 1], [], []>} : vector<8x8xf32>, vector<8x32xf32>, vector<8x32xf32> -> vector<8x32xf32>
    %149 = arith.addf %131, %148 : vector<8x32xf32>
    %150 = vector.extract_strided_slice %92 {offsets = [0, 24], sizes = [8, 8], strides = [1, 1]} : vector<8x32xf32> to vector<8x8xf32>
    %151 = vector.extract_strided_slice %93 {offsets = [0, 24], sizes = [8, 8], strides = [1, 1]} : vector<8x32xf32> to vector<8x8xf32>
    %cst_47 = arith.constant dense<0.000000e+00> : vector<8x8xf32>
    %152 = tpu.matmul %150, %151, %cst_47 {dimension_numbers = #tpu.dot_dimension_numbers<[1], [1], [0], [0], [0, 0, 1, 0], [], []>} : vector<8x8xf32>, vector<8x8xf32>, vector<8x8xf32> -> vector<8x8xf32>
    %cst_48 = arith.constant dense<0xFF800000> : vector<8xf32>
    %153 = vector.multi_reduction <maximumf>, %152, %cst_48 [1] : vector<8x8xf32> to vector<8xf32>
    %154 = vector.shape_cast %153 : vector<8xf32> to vector<8x1xf32>
    %155 = vector.broadcast %154 : vector<8x1xf32> to vector<8x8xf32>
    %156 = arith.subf %152, %155 : vector<8x8xf32>
    %157 = math.exp %156 : vector<8x8xf32>
    %cst_49 = arith.constant dense<0.000000e+00> : vector<8xf32>
    %158 = vector.multi_reduction <add>, %157, %cst_49 [1] : vector<8x8xf32> to vector<8xf32>
    %159 = vector.shape_cast %158 : vector<8xf32> to vector<8x1xf32>
    %160 = tpu.reciprocal %159 {approx = true} : vector<8x1xf32> -> vector<8x1xf32>
    %161 = vector.broadcast %160 : vector<8x1xf32> to vector<8x8xf32>
    %162 = arith.mulf %157, %161 : vector<8x8xf32>
    %163 = vector.extract_strided_slice %94 {offsets = [0, 24], sizes = [8, 8], strides = [1, 1]} : vector<8x32xf32> to vector<8x8xf32>
    %cst_50 = arith.constant dense<0.000000e+00> : vector<8x8xf32>
    %164 = tpu.matmul %162, %163, %cst_50 {dimension_numbers = #tpu.dot_dimension_numbers<[1], [0], [0], [1], [0, 0, 1, 1], [], []>} : vector<8x8xf32>, vector<8x8xf32>, vector<8x8xf32> -> vector<8x8xf32>
    %165 = vector.extract_strided_slice %7 {offsets = [24, 0], sizes = [8, 32], strides = [1, 1]} : vector<32x32xf32> to vector<8x32xf32>
    %cst_51 = arith.constant dense<0.000000e+00> : vector<8x32xf32>
    %166 = tpu.matmul %164, %165, %cst_51 {dimension_numbers = #tpu.dot_dimension_numbers<[1], [0], [0], [1], [0, 0, 1, 1], [], []>} : vector<8x8xf32>, vector<8x32xf32>, vector<8x32xf32> -> vector<8x32xf32>
    %167 = arith.addf %149, %166 : vector<8x32xf32>
    %168 = tpu.concatenate %91, %167 in 0 : vector<8x32xf32>, vector<8x32xf32> -> vector<16x32xf32>
    %169 = vector.broadcast %8 : vector<1x32xf32> to vector<16x32xf32>
    %170 = arith.addf %168, %169 : vector<16x32xf32>
    %171 = arith.addf %0, %170 : vector<16x32xf32>
    %c230 = arith.constant 230 : index
    %c0_52 = arith.constant 0 : index
    %172 = vector.load %arg2[%c230, %c0_52] : memref<240x128xf32, #tpu.memory_space<vmem>>, vector<1x32xf32>
    %c231 = arith.constant 231 : index
    %c0_53 = arith.constant 0 : index
    %173 = vector.load %arg2[%c231, %c0_53] : memref<240x128xf32, #tpu.memory_space<vmem>>, vector<1x32xf32>
    %cst_54 = arith.constant dense<0.000000e+00> : vector<16xf32>
    %174 = vector.multi_reduction <add>, %171, %cst_54 [1] : vector<16x32xf32> to vector<16xf32>
    %175 = vector.shape_cast %174 : vector<16xf32> to vector<16x1xf32>
    %cst_55 = arith.constant 3.200000e+01 : f32
    %176 = vector.broadcast %cst_55 : f32 to vector<16x1xf32>
    %177 = arith.divf %175, %176 : vector<16x1xf32>
    %178 = vector.broadcast %177 : vector<16x1xf32> to vector<16x32xf32>
    %179 = arith.subf %171, %178 : vector<16x32xf32>
    %180 = arith.mulf %179, %179 : vector<16x32xf32>
    %cst_56 = arith.constant dense<0.000000e+00> : vector<16xf32>
    %181 = vector.multi_reduction <add>, %180, %cst_56 [1] : vector<16x32xf32> to vector<16xf32>
    %182 = vector.shape_cast %181 : vector<16xf32> to vector<16x1xf32>
    %cst_57 = arith.constant 3.200000e+01 : f32
    %183 = vector.broadcast %cst_57 : f32 to vector<16x1xf32>
    %184 = arith.divf %182, %183 : vector<16x1xf32>
    %185 = vector.broadcast %177 : vector<16x1xf32> to vector<16x32xf32>
    %186 = arith.subf %171, %185 : vector<16x32xf32>
    %cst_58 = arith.constant 9.99999974E-6 : f32
    %187 = vector.broadcast %cst_58 : f32 to vector<16x1xf32>
    %188 = arith.addf %184, %187 : vector<16x1xf32>
    %189 = math.rsqrt %188 : vector<16x1xf32>
    %190 = vector.broadcast %189 : vector<16x1xf32> to vector<16x32xf32>
    %191 = arith.mulf %186, %190 : vector<16x32xf32>
    %192 = vector.broadcast %172 : vector<1x32xf32> to vector<16x32xf32>
    %193 = arith.mulf %191, %192 : vector<16x32xf32>
    %194 = vector.broadcast %173 : vector<1x32xf32> to vector<16x32xf32>
    %195 = arith.addf %193, %194 : vector<16x32xf32>
    %196 = arith.addf %195, %1 : vector<16x32xf32>
    %c64 = arith.constant 64 : index
    %c0_59 = arith.constant 0 : index
    %197 = vector.load %arg2[%c64, %c0_59] : memref<240x128xf32, #tpu.memory_space<vmem>>, vector<32x96xf32>
    %c226 = arith.constant 226 : index
    %c0_60 = arith.constant 0 : index
    %198 = vector.load %arg2[%c226, %c0_60] : memref<240x128xf32, #tpu.memory_space<vmem>>, vector<1x96xf32>
    %c96 = arith.constant 96 : index
    %c0_61 = arith.constant 0 : index
    %199 = vector.load %arg2[%c96, %c0_61] : memref<240x128xf32, #tpu.memory_space<vmem>>, vector<32x32xf32>
    %c227 = arith.constant 227 : index
    %c0_62 = arith.constant 0 : index
    %200 = vector.load %arg2[%c227, %c0_62] : memref<240x128xf32, #tpu.memory_space<vmem>>, vector<1x32xf32>
    %201 = tpu.concatenate %196, %3, %2 in 0 : vector<16x32xf32>, vector<24x32xf32>, vector<24x32xf32> -> vector<64x32xf32>
    %cst_63 = arith.constant dense<0.000000e+00> : vector<64x96xf32>
    %202 = tpu.matmul %201, %197, %cst_63 {dimension_numbers = #tpu.dot_dimension_numbers<[1], [0], [0], [1], [0, 0, 1, 1], [], []>} : vector<64x32xf32>, vector<32x96xf32>, vector<64x96xf32> -> vector<64x96xf32>
    %203 = vector.broadcast %198 : vector<1x96xf32> to vector<64x96xf32>
    %204 = arith.addf %202, %203 : vector<64x96xf32>
    %205 = vector.extract_strided_slice %204 {offsets = [0, 0], sizes = [16, 32], strides = [1, 1]} : vector<64x96xf32> to vector<16x32xf32>
    %206 = vector.extract_strided_slice %204 {offsets = [16, 32], sizes = [24, 32], strides = [1, 1]} : vector<64x96xf32> to vector<24x32xf32>
    %207 = vector.extract_strided_slice %204 {offsets = [40, 64], sizes = [24, 32], strides = [1, 1]} : vector<64x96xf32> to vector<24x32xf32>
    %208 = vector.extract_strided_slice %205 {offsets = [0, 0], sizes = [8, 32], strides = [1, 1]} : vector<16x32xf32> to vector<8x32xf32>
    %209 = vector.extract_strided_slice %206 {offsets = [0, 0], sizes = [12, 32], strides = [1, 1]} : vector<24x32xf32> to vector<12x32xf32>
    %210 = vector.extract_strided_slice %207 {offsets = [0, 0], sizes = [12, 32], strides = [1, 1]} : vector<24x32xf32> to vector<12x32xf32>
    %cst_64 = arith.constant 0.000000e+00 : f32
    %211 = vector.broadcast %cst_64 : f32 to vector<8x32xf32>
    %212 = vector.extract_strided_slice %208 {offsets = [0, 0], sizes = [8, 8], strides = [1, 1]} : vector<8x32xf32> to vector<8x8xf32>
    %213 = vector.extract_strided_slice %209 {offsets = [0, 0], sizes = [12, 8], strides = [1, 1]} : vector<12x32xf32> to vector<12x8xf32>
    %cst_65 = arith.constant dense<0.000000e+00> : vector<8x12xf32>
    %214 = tpu.matmul %212, %213, %cst_65 {dimension_numbers = #tpu.dot_dimension_numbers<[1], [1], [0], [0], [0, 0, 1, 0], [], []>} : vector<8x8xf32>, vector<12x8xf32>, vector<8x12xf32> -> vector<8x12xf32>
    %cst_66 = arith.constant dense<0xFF800000> : vector<8xf32>
    %215 = vector.multi_reduction <maximumf>, %214, %cst_66 [1] : vector<8x12xf32> to vector<8xf32>
    %216 = vector.shape_cast %215 : vector<8xf32> to vector<8x1xf32>
    %217 = vector.broadcast %216 : vector<8x1xf32> to vector<8x12xf32>
    %218 = arith.subf %214, %217 : vector<8x12xf32>
    %219 = math.exp %218 : vector<8x12xf32>
    %cst_67 = arith.constant dense<0.000000e+00> : vector<8xf32>
    %220 = vector.multi_reduction <add>, %219, %cst_67 [1] : vector<8x12xf32> to vector<8xf32>
    %221 = vector.shape_cast %220 : vector<8xf32> to vector<8x1xf32>
    %222 = tpu.reciprocal %221 {approx = true} : vector<8x1xf32> -> vector<8x1xf32>
    %223 = vector.broadcast %222 : vector<8x1xf32> to vector<8x12xf32>
    %224 = arith.mulf %219, %223 : vector<8x12xf32>
    %225 = vector.extract_strided_slice %210 {offsets = [0, 0], sizes = [12, 8], strides = [1, 1]} : vector<12x32xf32> to vector<12x8xf32>
    %cst_68 = arith.constant dense<0.000000e+00> : vector<8x8xf32>
    %226 = tpu.matmul %224, %225, %cst_68 {dimension_numbers = #tpu.dot_dimension_numbers<[1], [0], [0], [1], [0, 0, 1, 1], [], []>} : vector<8x12xf32>, vector<12x8xf32>, vector<8x8xf32> -> vector<8x8xf32>
    %227 = vector.extract_strided_slice %199 {offsets = [0, 0], sizes = [8, 32], strides = [1, 1]} : vector<32x32xf32> to vector<8x32xf32>
    %cst_69 = arith.constant dense<0.000000e+00> : vector<8x32xf32>
    %228 = tpu.matmul %226, %227, %cst_69 {dimension_numbers = #tpu.dot_dimension_numbers<[1], [0], [0], [1], [0, 0, 1, 1], [], []>} : vector<8x8xf32>, vector<8x32xf32>, vector<8x32xf32> -> vector<8x32xf32>
    %229 = arith.addf %211, %228 : vector<8x32xf32>
    %230 = vector.extract_strided_slice %208 {offsets = [0, 8], sizes = [8, 8], strides = [1, 1]} : vector<8x32xf32> to vector<8x8xf32>
    %231 = vector.extract_strided_slice %209 {offsets = [0, 8], sizes = [12, 8], strides = [1, 1]} : vector<12x32xf32> to vector<12x8xf32>
    %cst_70 = arith.constant dense<0.000000e+00> : vector<8x12xf32>
    %232 = tpu.matmul %230, %231, %cst_70 {dimension_numbers = #tpu.dot_dimension_numbers<[1], [1], [0], [0], [0, 0, 1, 0], [], []>} : vector<8x8xf32>, vector<12x8xf32>, vector<8x12xf32> -> vector<8x12xf32>
    %cst_71 = arith.constant dense<0xFF800000> : vector<8xf32>
    %233 = vector.multi_reduction <maximumf>, %232, %cst_71 [1] : vector<8x12xf32> to vector<8xf32>
    %234 = vector.shape_cast %233 : vector<8xf32> to vector<8x1xf32>
    %235 = vector.broadcast %234 : vector<8x1xf32> to vector<8x12xf32>
    %236 = arith.subf %232, %235 : vector<8x12xf32>
    %237 = math.exp %236 : vector<8x12xf32>
    %cst_72 = arith.constant dense<0.000000e+00> : vector<8xf32>
    %238 = vector.multi_reduction <add>, %237, %cst_72 [1] : vector<8x12xf32> to vector<8xf32>
    %239 = vector.shape_cast %238 : vector<8xf32> to vector<8x1xf32>
    %240 = tpu.reciprocal %239 {approx = true} : vector<8x1xf32> -> vector<8x1xf32>
    %241 = vector.broadcast %240 : vector<8x1xf32> to vector<8x12xf32>
    %242 = arith.mulf %237, %241 : vector<8x12xf32>
    %243 = vector.extract_strided_slice %210 {offsets = [0, 8], sizes = [12, 8], strides = [1, 1]} : vector<12x32xf32> to vector<12x8xf32>
    %cst_73 = arith.constant dense<0.000000e+00> : vector<8x8xf32>
    %244 = tpu.matmul %242, %243, %cst_73 {dimension_numbers = #tpu.dot_dimension_numbers<[1], [0], [0], [1], [0, 0, 1, 1], [], []>} : vector<8x12xf32>, vector<12x8xf32>, vector<8x8xf32> -> vector<8x8xf32>
    %245 = vector.extract_strided_slice %199 {offsets = [8, 0], sizes = [8, 32], strides = [1, 1]} : vector<32x32xf32> to vector<8x32xf32>
    %cst_74 = arith.constant dense<0.000000e+00> : vector<8x32xf32>
    %246 = tpu.matmul %244, %245, %cst_74 {dimension_numbers = #tpu.dot_dimension_numbers<[1], [0], [0], [1], [0, 0, 1, 1], [], []>} : vector<8x8xf32>, vector<8x32xf32>, vector<8x32xf32> -> vector<8x32xf32>
    %247 = arith.addf %229, %246 : vector<8x32xf32>
    %248 = vector.extract_strided_slice %208 {offsets = [0, 16], sizes = [8, 8], strides = [1, 1]} : vector<8x32xf32> to vector<8x8xf32>
    %249 = vector.extract_strided_slice %209 {offsets = [0, 16], sizes = [12, 8], strides = [1, 1]} : vector<12x32xf32> to vector<12x8xf32>
    %cst_75 = arith.constant dense<0.000000e+00> : vector<8x12xf32>
    %250 = tpu.matmul %248, %249, %cst_75 {dimension_numbers = #tpu.dot_dimension_numbers<[1], [1], [0], [0], [0, 0, 1, 0], [], []>} : vector<8x8xf32>, vector<12x8xf32>, vector<8x12xf32> -> vector<8x12xf32>
    %cst_76 = arith.constant dense<0xFF800000> : vector<8xf32>
    %251 = vector.multi_reduction <maximumf>, %250, %cst_76 [1] : vector<8x12xf32> to vector<8xf32>
    %252 = vector.shape_cast %251 : vector<8xf32> to vector<8x1xf32>
    %253 = vector.broadcast %252 : vector<8x1xf32> to vector<8x12xf32>
    %254 = arith.subf %250, %253 : vector<8x12xf32>
    %255 = math.exp %254 : vector<8x12xf32>
    %cst_77 = arith.constant dense<0.000000e+00> : vector<8xf32>
    %256 = vector.multi_reduction <add>, %255, %cst_77 [1] : vector<8x12xf32> to vector<8xf32>
    %257 = vector.shape_cast %256 : vector<8xf32> to vector<8x1xf32>
    %258 = tpu.reciprocal %257 {approx = true} : vector<8x1xf32> -> vector<8x1xf32>
    %259 = vector.broadcast %258 : vector<8x1xf32> to vector<8x12xf32>
    %260 = arith.mulf %255, %259 : vector<8x12xf32>
    %261 = vector.extract_strided_slice %210 {offsets = [0, 16], sizes = [12, 8], strides = [1, 1]} : vector<12x32xf32> to vector<12x8xf32>
    %cst_78 = arith.constant dense<0.000000e+00> : vector<8x8xf32>
    %262 = tpu.matmul %260, %261, %cst_78 {dimension_numbers = #tpu.dot_dimension_numbers<[1], [0], [0], [1], [0, 0, 1, 1], [], []>} : vector<8x12xf32>, vector<12x8xf32>, vector<8x8xf32> -> vector<8x8xf32>
    %263 = vector.extract_strided_slice %199 {offsets = [16, 0], sizes = [8, 32], strides = [1, 1]} : vector<32x32xf32> to vector<8x32xf32>
    %cst_79 = arith.constant dense<0.000000e+00> : vector<8x32xf32>
    %264 = tpu.matmul %262, %263, %cst_79 {dimension_numbers = #tpu.dot_dimension_numbers<[1], [0], [0], [1], [0, 0, 1, 1], [], []>} : vector<8x8xf32>, vector<8x32xf32>, vector<8x32xf32> -> vector<8x32xf32>
    %265 = arith.addf %247, %264 : vector<8x32xf32>
    %266 = vector.extract_strided_slice %208 {offsets = [0, 24], sizes = [8, 8], strides = [1, 1]} : vector<8x32xf32> to vector<8x8xf32>
    %267 = vector.extract_strided_slice %209 {offsets = [0, 24], sizes = [12, 8], strides = [1, 1]} : vector<12x32xf32> to vector<12x8xf32>
    %cst_80 = arith.constant dense<0.000000e+00> : vector<8x12xf32>
    %268 = tpu.matmul %266, %267, %cst_80 {dimension_numbers = #tpu.dot_dimension_numbers<[1], [1], [0], [0], [0, 0, 1, 0], [], []>} : vector<8x8xf32>, vector<12x8xf32>, vector<8x12xf32> -> vector<8x12xf32>
    %cst_81 = arith.constant dense<0xFF800000> : vector<8xf32>
    %269 = vector.multi_reduction <maximumf>, %268, %cst_81 [1] : vector<8x12xf32> to vector<8xf32>
    %270 = vector.shape_cast %269 : vector<8xf32> to vector<8x1xf32>
    %271 = vector.broadcast %270 : vector<8x1xf32> to vector<8x12xf32>
    %272 = arith.subf %268, %271 : vector<8x12xf32>
    %273 = math.exp %272 : vector<8x12xf32>
    %cst_82 = arith.constant dense<0.000000e+00> : vector<8xf32>
    %274 = vector.multi_reduction <add>, %273, %cst_82 [1] : vector<8x12xf32> to vector<8xf32>
    %275 = vector.shape_cast %274 : vector<8xf32> to vector<8x1xf32>
    %276 = tpu.reciprocal %275 {approx = true} : vector<8x1xf32> -> vector<8x1xf32>
    %277 = vector.broadcast %276 : vector<8x1xf32> to vector<8x12xf32>
    %278 = arith.mulf %273, %277 : vector<8x12xf32>
    %279 = vector.extract_strided_slice %210 {offsets = [0, 24], sizes = [12, 8], strides = [1, 1]} : vector<12x32xf32> to vector<12x8xf32>
    %cst_83 = arith.constant dense<0.000000e+00> : vector<8x8xf32>
    %280 = tpu.matmul %278, %279, %cst_83 {dimension_numbers = #tpu.dot_dimension_numbers<[1], [0], [0], [1], [0, 0, 1, 1], [], []>} : vector<8x12xf32>, vector<12x8xf32>, vector<8x8xf32> -> vector<8x8xf32>
    %281 = vector.extract_strided_slice %199 {offsets = [24, 0], sizes = [8, 32], strides = [1, 1]} : vector<32x32xf32> to vector<8x32xf32>
    %cst_84 = arith.constant dense<0.000000e+00> : vector<8x32xf32>
    %282 = tpu.matmul %280, %281, %cst_84 {dimension_numbers = #tpu.dot_dimension_numbers<[1], [0], [0], [1], [0, 0, 1, 1], [], []>} : vector<8x8xf32>, vector<8x32xf32>, vector<8x32xf32> -> vector<8x32xf32>
    %283 = arith.addf %265, %282 : vector<8x32xf32>
    %284 = vector.extract_strided_slice %205 {offsets = [8, 0], sizes = [8, 32], strides = [1, 1]} : vector<16x32xf32> to vector<8x32xf32>
    %285 = vector.extract_strided_slice %206 {offsets = [12, 0], sizes = [12, 32], strides = [1, 1]} : vector<24x32xf32> to vector<12x32xf32>
    %286 = vector.extract_strided_slice %207 {offsets = [12, 0], sizes = [12, 32], strides = [1, 1]} : vector<24x32xf32> to vector<12x32xf32>
    %cst_85 = arith.constant 0.000000e+00 : f32
    %287 = vector.broadcast %cst_85 : f32 to vector<8x32xf32>
    %288 = vector.extract_strided_slice %284 {offsets = [0, 0], sizes = [8, 8], strides = [1, 1]} : vector<8x32xf32> to vector<8x8xf32>
    %289 = vector.extract_strided_slice %285 {offsets = [0, 0], sizes = [12, 8], strides = [1, 1]} : vector<12x32xf32> to vector<12x8xf32>
    %cst_86 = arith.constant dense<0.000000e+00> : vector<8x12xf32>
    %290 = tpu.matmul %288, %289, %cst_86 {dimension_numbers = #tpu.dot_dimension_numbers<[1], [1], [0], [0], [0, 0, 1, 0], [], []>} : vector<8x8xf32>, vector<12x8xf32>, vector<8x12xf32> -> vector<8x12xf32>
    %cst_87 = arith.constant dense<0xFF800000> : vector<8xf32>
    %291 = vector.multi_reduction <maximumf>, %290, %cst_87 [1] : vector<8x12xf32> to vector<8xf32>
    %292 = vector.shape_cast %291 : vector<8xf32> to vector<8x1xf32>
    %293 = vector.broadcast %292 : vector<8x1xf32> to vector<8x12xf32>
    %294 = arith.subf %290, %293 : vector<8x12xf32>
    %295 = math.exp %294 : vector<8x12xf32>
    %cst_88 = arith.constant dense<0.000000e+00> : vector<8xf32>
    %296 = vector.multi_reduction <add>, %295, %cst_88 [1] : vector<8x12xf32> to vector<8xf32>
    %297 = vector.shape_cast %296 : vector<8xf32> to vector<8x1xf32>
    %298 = tpu.reciprocal %297 {approx = true} : vector<8x1xf32> -> vector<8x1xf32>
    %299 = vector.broadcast %298 : vector<8x1xf32> to vector<8x12xf32>
    %300 = arith.mulf %295, %299 : vector<8x12xf32>
    %301 = vector.extract_strided_slice %286 {offsets = [0, 0], sizes = [12, 8], strides = [1, 1]} : vector<12x32xf32> to vector<12x8xf32>
    %cst_89 = arith.constant dense<0.000000e+00> : vector<8x8xf32>
    %302 = tpu.matmul %300, %301, %cst_89 {dimension_numbers = #tpu.dot_dimension_numbers<[1], [0], [0], [1], [0, 0, 1, 1], [], []>} : vector<8x12xf32>, vector<12x8xf32>, vector<8x8xf32> -> vector<8x8xf32>
    %303 = vector.extract_strided_slice %199 {offsets = [0, 0], sizes = [8, 32], strides = [1, 1]} : vector<32x32xf32> to vector<8x32xf32>
    %cst_90 = arith.constant dense<0.000000e+00> : vector<8x32xf32>
    %304 = tpu.matmul %302, %303, %cst_90 {dimension_numbers = #tpu.dot_dimension_numbers<[1], [0], [0], [1], [0, 0, 1, 1], [], []>} : vector<8x8xf32>, vector<8x32xf32>, vector<8x32xf32> -> vector<8x32xf32>
    %305 = arith.addf %287, %304 : vector<8x32xf32>
    %306 = vector.extract_strided_slice %284 {offsets = [0, 8], sizes = [8, 8], strides = [1, 1]} : vector<8x32xf32> to vector<8x8xf32>
    %307 = vector.extract_strided_slice %285 {offsets = [0, 8], sizes = [12, 8], strides = [1, 1]} : vector<12x32xf32> to vector<12x8xf32>
    %cst_91 = arith.constant dense<0.000000e+00> : vector<8x12xf32>
    %308 = tpu.matmul %306, %307, %cst_91 {dimension_numbers = #tpu.dot_dimension_numbers<[1], [1], [0], [0], [0, 0, 1, 0], [], []>} : vector<8x8xf32>, vector<12x8xf32>, vector<8x12xf32> -> vector<8x12xf32>
    %cst_92 = arith.constant dense<0xFF800000> : vector<8xf32>
    %309 = vector.multi_reduction <maximumf>, %308, %cst_92 [1] : vector<8x12xf32> to vector<8xf32>
    %310 = vector.shape_cast %309 : vector<8xf32> to vector<8x1xf32>
    %311 = vector.broadcast %310 : vector<8x1xf32> to vector<8x12xf32>
    %312 = arith.subf %308, %311 : vector<8x12xf32>
    %313 = math.exp %312 : vector<8x12xf32>
    %cst_93 = arith.constant dense<0.000000e+00> : vector<8xf32>
    %314 = vector.multi_reduction <add>, %313, %cst_93 [1] : vector<8x12xf32> to vector<8xf32>
    %315 = vector.shape_cast %314 : vector<8xf32> to vector<8x1xf32>
    %316 = tpu.reciprocal %315 {approx = true} : vector<8x1xf32> -> vector<8x1xf32>
    %317 = vector.broadcast %316 : vector<8x1xf32> to vector<8x12xf32>
    %318 = arith.mulf %313, %317 : vector<8x12xf32>
    %319 = vector.extract_strided_slice %286 {offsets = [0, 8], sizes = [12, 8], strides = [1, 1]} : vector<12x32xf32> to vector<12x8xf32>
    %cst_94 = arith.constant dense<0.000000e+00> : vector<8x8xf32>
    %320 = tpu.matmul %318, %319, %cst_94 {dimension_numbers = #tpu.dot_dimension_numbers<[1], [0], [0], [1], [0, 0, 1, 1], [], []>} : vector<8x12xf32>, vector<12x8xf32>, vector<8x8xf32> -> vector<8x8xf32>
    %321 = vector.extract_strided_slice %199 {offsets = [8, 0], sizes = [8, 32], strides = [1, 1]} : vector<32x32xf32> to vector<8x32xf32>
    %cst_95 = arith.constant dense<0.000000e+00> : vector<8x32xf32>
    %322 = tpu.matmul %320, %321, %cst_95 {dimension_numbers = #tpu.dot_dimension_numbers<[1], [0], [0], [1], [0, 0, 1, 1], [], []>} : vector<8x8xf32>, vector<8x32xf32>, vector<8x32xf32> -> vector<8x32xf32>
    %323 = arith.addf %305, %322 : vector<8x32xf32>
    %324 = vector.extract_strided_slice %284 {offsets = [0, 16], sizes = [8, 8], strides = [1, 1]} : vector<8x32xf32> to vector<8x8xf32>
    %325 = vector.extract_strided_slice %285 {offsets = [0, 16], sizes = [12, 8], strides = [1, 1]} : vector<12x32xf32> to vector<12x8xf32>
    %cst_96 = arith.constant dense<0.000000e+00> : vector<8x12xf32>
    %326 = tpu.matmul %324, %325, %cst_96 {dimension_numbers = #tpu.dot_dimension_numbers<[1], [1], [0], [0], [0, 0, 1, 0], [], []>} : vector<8x8xf32>, vector<12x8xf32>, vector<8x12xf32> -> vector<8x12xf32>
    %cst_97 = arith.constant dense<0xFF800000> : vector<8xf32>
    %327 = vector.multi_reduction <maximumf>, %326, %cst_97 [1] : vector<8x12xf32> to vector<8xf32>
    %328 = vector.shape_cast %327 : vector<8xf32> to vector<8x1xf32>
    %329 = vector.broadcast %328 : vector<8x1xf32> to vector<8x12xf32>
    %330 = arith.subf %326, %329 : vector<8x12xf32>
    %331 = math.exp %330 : vector<8x12xf32>
    %cst_98 = arith.constant dense<0.000000e+00> : vector<8xf32>
    %332 = vector.multi_reduction <add>, %331, %cst_98 [1] : vector<8x12xf32> to vector<8xf32>
    %333 = vector.shape_cast %332 : vector<8xf32> to vector<8x1xf32>
    %334 = tpu.reciprocal %333 {approx = true} : vector<8x1xf32> -> vector<8x1xf32>
    %335 = vector.broadcast %334 : vector<8x1xf32> to vector<8x12xf32>
    %336 = arith.mulf %331, %335 : vector<8x12xf32>
    %337 = vector.extract_strided_slice %286 {offsets = [0, 16], sizes = [12, 8], strides = [1, 1]} : vector<12x32xf32> to vector<12x8xf32>
    %cst_99 = arith.constant dense<0.000000e+00> : vector<8x8xf32>
    %338 = tpu.matmul %336, %337, %cst_99 {dimension_numbers = #tpu.dot_dimension_numbers<[1], [0], [0], [1], [0, 0, 1, 1], [], []>} : vector<8x12xf32>, vector<12x8xf32>, vector<8x8xf32> -> vector<8x8xf32>
    %339 = vector.extract_strided_slice %199 {offsets = [16, 0], sizes = [8, 32], strides = [1, 1]} : vector<32x32xf32> to vector<8x32xf32>
    %cst_100 = arith.constant dense<0.000000e+00> : vector<8x32xf32>
    %340 = tpu.matmul %338, %339, %cst_100 {dimension_numbers = #tpu.dot_dimension_numbers<[1], [0], [0], [1], [0, 0, 1, 1], [], []>} : vector<8x8xf32>, vector<8x32xf32>, vector<8x32xf32> -> vector<8x32xf32>
    %341 = arith.addf %323, %340 : vector<8x32xf32>
    %342 = vector.extract_strided_slice %284 {offsets = [0, 24], sizes = [8, 8], strides = [1, 1]} : vector<8x32xf32> to vector<8x8xf32>
    %343 = vector.extract_strided_slice %285 {offsets = [0, 24], sizes = [12, 8], strides = [1, 1]} : vector<12x32xf32> to vector<12x8xf32>
    %cst_101 = arith.constant dense<0.000000e+00> : vector<8x12xf32>
    %344 = tpu.matmul %342, %343, %cst_101 {dimension_numbers = #tpu.dot_dimension_numbers<[1], [1], [0], [0], [0, 0, 1, 0], [], []>} : vector<8x8xf32>, vector<12x8xf32>, vector<8x12xf32> -> vector<8x12xf32>
    %cst_102 = arith.constant dense<0xFF800000> : vector<8xf32>
    %345 = vector.multi_reduction <maximumf>, %344, %cst_102 [1] : vector<8x12xf32> to vector<8xf32>
    %346 = vector.shape_cast %345 : vector<8xf32> to vector<8x1xf32>
    %347 = vector.broadcast %346 : vector<8x1xf32> to vector<8x12xf32>
    %348 = arith.subf %344, %347 : vector<8x12xf32>
    %349 = math.exp %348 : vector<8x12xf32>
    %cst_103 = arith.constant dense<0.000000e+00> : vector<8xf32>
    %350 = vector.multi_reduction <add>, %349, %cst_103 [1] : vector<8x12xf32> to vector<8xf32>
    %351 = vector.shape_cast %350 : vector<8xf32> to vector<8x1xf32>
    %352 = tpu.reciprocal %351 {approx = true} : vector<8x1xf32> -> vector<8x1xf32>
    %353 = vector.broadcast %352 : vector<8x1xf32> to vector<8x12xf32>
    %354 = arith.mulf %349, %353 : vector<8x12xf32>
    %355 = vector.extract_strided_slice %286 {offsets = [0, 24], sizes = [12, 8], strides = [1, 1]} : vector<12x32xf32> to vector<12x8xf32>
    %cst_104 = arith.constant dense<0.000000e+00> : vector<8x8xf32>
    %356 = tpu.matmul %354, %355, %cst_104 {dimension_numbers = #tpu.dot_dimension_numbers<[1], [0], [0], [1], [0, 0, 1, 1], [], []>} : vector<8x12xf32>, vector<12x8xf32>, vector<8x8xf32> -> vector<8x8xf32>
    %357 = vector.extract_strided_slice %199 {offsets = [24, 0], sizes = [8, 32], strides = [1, 1]} : vector<32x32xf32> to vector<8x32xf32>
    %cst_105 = arith.constant dense<0.000000e+00> : vector<8x32xf32>
    %358 = tpu.matmul %356, %357, %cst_105 {dimension_numbers = #tpu.dot_dimension_numbers<[1], [0], [0], [1], [0, 0, 1, 1], [], []>} : vector<8x8xf32>, vector<8x32xf32>, vector<8x32xf32> -> vector<8x32xf32>
    %359 = arith.addf %341, %358 : vector<8x32xf32>
    %360 = tpu.concatenate %283, %359 in 0 : vector<8x32xf32>, vector<8x32xf32> -> vector<16x32xf32>
    %361 = vector.broadcast %200 : vector<1x32xf32> to vector<16x32xf32>
    %362 = arith.addf %360, %361 : vector<16x32xf32>
    %363 = arith.addf %195, %362 : vector<16x32xf32>
    %c232 = arith.constant 232 : index
    %c0_106 = arith.constant 0 : index
    %364 = vector.load %arg2[%c232, %c0_106] : memref<240x128xf32, #tpu.memory_space<vmem>>, vector<1x32xf32>
    %c233 = arith.constant 233 : index
    %c0_107 = arith.constant 0 : index
    %365 = vector.load %arg2[%c233, %c0_107] : memref<240x128xf32, #tpu.memory_space<vmem>>, vector<1x32xf32>
    %cst_108 = arith.constant dense<0.000000e+00> : vector<16xf32>
    %366 = vector.multi_reduction <add>, %363, %cst_108 [1] : vector<16x32xf32> to vector<16xf32>
    %367 = vector.shape_cast %366 : vector<16xf32> to vector<16x1xf32>
    %cst_109 = arith.constant 3.200000e+01 : f32
    %368 = vector.broadcast %cst_109 : f32 to vector<16x1xf32>
    %369 = arith.divf %367, %368 : vector<16x1xf32>
    %370 = vector.broadcast %369 : vector<16x1xf32> to vector<16x32xf32>
    %371 = arith.subf %363, %370 : vector<16x32xf32>
    %372 = arith.mulf %371, %371 : vector<16x32xf32>
    %cst_110 = arith.constant dense<0.000000e+00> : vector<16xf32>
    %373 = vector.multi_reduction <add>, %372, %cst_110 [1] : vector<16x32xf32> to vector<16xf32>
    %374 = vector.shape_cast %373 : vector<16xf32> to vector<16x1xf32>
    %cst_111 = arith.constant 3.200000e+01 : f32
    %375 = vector.broadcast %cst_111 : f32 to vector<16x1xf32>
    %376 = arith.divf %374, %375 : vector<16x1xf32>
    %377 = vector.broadcast %369 : vector<16x1xf32> to vector<16x32xf32>
    %378 = arith.subf %363, %377 : vector<16x32xf32>
    %cst_112 = arith.constant 9.99999974E-6 : f32
    %379 = vector.broadcast %cst_112 : f32 to vector<16x1xf32>
    %380 = arith.addf %376, %379 : vector<16x1xf32>
    %381 = math.rsqrt %380 : vector<16x1xf32>
    %382 = vector.broadcast %381 : vector<16x1xf32> to vector<16x32xf32>
    %383 = arith.mulf %378, %382 : vector<16x32xf32>
    %384 = vector.broadcast %364 : vector<1x32xf32> to vector<16x32xf32>
    %385 = arith.mulf %383, %384 : vector<16x32xf32>
    %386 = vector.broadcast %365 : vector<1x32xf32> to vector<16x32xf32>
    %387 = arith.addf %385, %386 : vector<16x32xf32>
    %c128 = arith.constant 128 : index
    %c0_113 = arith.constant 0 : index
    %388 = vector.load %arg2[%c128, %c0_113] : memref<240x128xf32, #tpu.memory_space<vmem>>, vector<32x64xf32>
    %cst_114 = arith.constant dense<0.000000e+00> : vector<16x64xf32>
    %389 = tpu.matmul %387, %388, %cst_114 {dimension_numbers = #tpu.dot_dimension_numbers<[1], [0], [0], [1], [0, 0, 1, 1], [], []>} : vector<16x32xf32>, vector<32x64xf32>, vector<16x64xf32> -> vector<16x64xf32>
    %c228 = arith.constant 228 : index
    %c0_115 = arith.constant 0 : index
    %390 = vector.load %arg2[%c228, %c0_115] : memref<240x128xf32, #tpu.memory_space<vmem>>, vector<1x64xf32>
    %391 = vector.broadcast %390 : vector<1x64xf32> to vector<16x64xf32>
    %392 = arith.addf %389, %391 : vector<16x64xf32>
    %cst_116 = arith.constant 0.000000e+00 : f32
    %393 = vector.broadcast %cst_116 : f32 to vector<16x64xf32>
    %394 = arith.maximumf %392, %393 : vector<16x64xf32>
    %c160 = arith.constant 160 : index
    %c0_117 = arith.constant 0 : index
    %395 = vector.load %arg2[%c160, %c0_117] : memref<240x128xf32, #tpu.memory_space<vmem>>, vector<64x32xf32>
    %cst_118 = arith.constant dense<0.000000e+00> : vector<16x32xf32>
    %396 = tpu.matmul %394, %395, %cst_118 {dimension_numbers = #tpu.dot_dimension_numbers<[1], [0], [0], [1], [0, 0, 1, 1], [], []>} : vector<16x64xf32>, vector<64x32xf32>, vector<16x32xf32> -> vector<16x32xf32>
    %c229 = arith.constant 229 : index
    %c0_119 = arith.constant 0 : index
    %397 = vector.load %arg2[%c229, %c0_119] : memref<240x128xf32, #tpu.memory_space<vmem>>, vector<1x32xf32>
    %398 = vector.broadcast %397 : vector<1x32xf32> to vector<16x32xf32>
    %399 = arith.addf %396, %398 : vector<16x32xf32>
    %400 = arith.addf %387, %399 : vector<16x32xf32>
    %c234 = arith.constant 234 : index
    %c0_120 = arith.constant 0 : index
    %401 = vector.load %arg2[%c234, %c0_120] : memref<240x128xf32, #tpu.memory_space<vmem>>, vector<1x32xf32>
    %c235 = arith.constant 235 : index
    %c0_121 = arith.constant 0 : index
    %402 = vector.load %arg2[%c235, %c0_121] : memref<240x128xf32, #tpu.memory_space<vmem>>, vector<1x32xf32>
    %cst_122 = arith.constant dense<0.000000e+00> : vector<16xf32>
    %403 = vector.multi_reduction <add>, %400, %cst_122 [1] : vector<16x32xf32> to vector<16xf32>
    %404 = vector.shape_cast %403 : vector<16xf32> to vector<16x1xf32>
    %cst_123 = arith.constant 3.200000e+01 : f32
    %405 = vector.broadcast %cst_123 : f32 to vector<16x1xf32>
    %406 = arith.divf %404, %405 : vector<16x1xf32>
    %407 = vector.broadcast %406 : vector<16x1xf32> to vector<16x32xf32>
    %408 = arith.subf %400, %407 : vector<16x32xf32>
    %409 = arith.mulf %408, %408 : vector<16x32xf32>
    %cst_124 = arith.constant dense<0.000000e+00> : vector<16xf32>
    %410 = vector.multi_reduction <add>, %409, %cst_124 [1] : vector<16x32xf32> to vector<16xf32>
    %411 = vector.shape_cast %410 : vector<16xf32> to vector<16x1xf32>
    %cst_125 = arith.constant 3.200000e+01 : f32
    %412 = vector.broadcast %cst_125 : f32 to vector<16x1xf32>
    %413 = arith.divf %411, %412 : vector<16x1xf32>
    %414 = vector.broadcast %406 : vector<16x1xf32> to vector<16x32xf32>
    %415 = arith.subf %400, %414 : vector<16x32xf32>
    %cst_126 = arith.constant 9.99999974E-6 : f32
    %416 = vector.broadcast %cst_126 : f32 to vector<16x1xf32>
    %417 = arith.addf %413, %416 : vector<16x1xf32>
    %418 = math.rsqrt %417 : vector<16x1xf32>
    %419 = vector.broadcast %418 : vector<16x1xf32> to vector<16x32xf32>
    %420 = arith.mulf %415, %419 : vector<16x32xf32>
    %421 = vector.broadcast %401 : vector<1x32xf32> to vector<16x32xf32>
    %422 = arith.mulf %420, %421 : vector<16x32xf32>
    %423 = vector.broadcast %402 : vector<1x32xf32> to vector<16x32xf32>
    %424 = arith.addf %422, %423 : vector<16x32xf32>
    %c0_127 = arith.constant 0 : index
    %c0_128 = arith.constant 0 : index
    %425 = vector.load %arg3[%c0_127, %c0_128] : memref<16x32xf32, #tpu.memory_space<vmem>>, vector<16x32xf32>
    tpu.vector_store %arg3[%c0_127, %c0_128], %424 {strides = array<i32>} : memref<16x32xf32, #tpu.memory_space<vmem>>, vector<16x32xf32>,
    return
  }
  func.func @transform_0(%arg0: i32) -> (i32, i32) {
    %c0_i32 = arith.constant 0 : i32
    %c0_i32_0 = arith.constant 0 : i32
    %c0_i32_1 = arith.constant 0 : i32
    return %c0_i32, %c0_i32_0 : i32, i32
  }
  func.func @transform_1(%arg0: i32) -> (i32, i32) {
    %c0_i32 = arith.constant 0 : i32
    %c0_i32_0 = arith.constant 0 : i32
    %c0_i32_1 = arith.constant 0 : i32
    return %c0_i32, %c0_i32_0 : i32, i32
  }
  func.func @transform_2(%arg0: i32) -> (i32, i32) {
    %c0_i32 = arith.constant 0 : i32
    %c0_i32_0 = arith.constant 0 : i32
    %c0_i32_1 = arith.constant 0 : i32
    return %c0_i32, %c0_i32_0 : i32, i32
  }
}

</mosaic_0001>

<bundles_post_ra>
// kernel: tpu_custom_call.1
= control target key start
LH: loop header
LB: loop body
LE: loop exit
PB: predicated region body
PF: predicated region fallthrough
CT: control target
= control target key end

     0   :  { %7 = vsyncpa [#allocation3], 0  ;;  %s5900_s0 = inlined_call_operand.vmem [shape: f32[80,32], index: 0, kind: input, shape index: {}]   ;;  %s5901_s1 = inlined_call_operand.hbm [shape: f32[240,128], index: 1, kind: input, shape index: {}]   ;;  %s5902_s2 = inlined_call_operand.hbm [shape: f32[16,32], index: 2, kind: output, shape index: {}]  }
   0x1   :  { %8 = vsyncpa [#allocation4], 0  ;;  %s5262_s9 = smov [#allocation2]  }
   0x2   :  { %s16_s10 = sshll.u32 %s5262_s9, 4  ;;  %s17_s10 = int_to_ptr.vmem [resolvable:$true] %s16_s10 }
   0x3   :  { %s5226_s11 = scalar_lea.vmem %s17_s10, 3840  ;;  %p5231_p1 = scmp.lt.s32.totalorder %s17_s10, %s17_s10 }
   0x4   :  { %p5227_p0 = scmp.ne.s32.totalorder %s17_s10, %s5226_s11  ;;  %p5232_p2 = scmp.lt.s32.totalorder %s5226_s11, %s5226_s11 }
   0x6   :  { %p5233_p3 = por %p5232_p2, %p5231_p1 }
   0x8   :  { %p5234_p4 = pnand %p5233_p3, %p5227_p0 }
   0xa   :  { %5237 = shalt.err (!%p5234_p4)
}
   0xb   :  { %s5263_s12 = smov 128   ;;  %s5264_s13 = smov 8  }
   0xc   :  { %22 = dma.hbm_to_vmem [thread:$0]  %s5901_s1, 3840, %s17_s10, [#allocation3], %s5263_s12, %s5263_s12, %s5264_s13  }
   0xd   :  { %5258 = dma.done.wait [#allocation3], 3840  }
   0xe   :  { %5259 = vsyncadd [#allocation3], 4294963456  ;;  %v41_v0 = vld [vmem:[#allocation2 + $0x18] sm:$0xff]  ;;  %v40_v1 = vld [vmem:[#allocation2 + $0x10] sm:$0xff]  ;;  %vm52_vm0 = vcmask 261120   ;;  %v5265_v10 = vmov 0.0  }
   0xf   :  { %4789 = vmatprep.subr.mxu0 %v41_v0  ;;  %v5303_v2 = vld [vmem:[%s5900_s0] sm:$0xff]  ;;  %v5308_v3 = vld [vmem:[%s5900_s0 + $0x10] sm:$0xff]  ;;  %v39_v4 = vld [vmem:[#allocation2 + $0x8] sm:$0xff]  ;;  %4808 = vmatprep.subr.mxu1 %v5265_v10  ;;  %vm5266_vm1 = vmmov 0   ;;  %s5267_s23 = smov 96   ;;  %s5268_s24 = smov 64  }
  0x10   :  { %4790 = vmatpush3.msra.mxu0 %v41_v0  ;;  %v36_v5 = vadd.f32 %v5308_v3, %v5303_v2  ;;  %v5315_v6 = vld [vmem:[%s5900_s0 + $0x8] sm:$0xff]  ;;  %v5320_v7 = vld [vmem:[%s5900_s0 + $0x18] sm:$0xff]  ;;  %v38_v8 = vld [vmem:[#allocation2] sm:$0xff]  ;;  %4810 = vmatprep.mubr.msk.f32.mxu1 %vm5266_vm1, %v5265_v10  ;;  %s5269_s25 = smov 88   ;;  %vm153_vm2 = vcmask 64512   ;;  %s5270_s26 = smov 120  }
  0x11   :  { %4791 = vmatprep.subr.mxu0 %v40_v1  ;;  %v37_v9 = vadd.f32 %v5320_v7, %v5315_v6  ;;  %v4533_v11 = vld [vmem:[#allocation2 + $0xe0] ss:$0 sm:$0xff]  ;;  %s5271_s27 = smov 56   ;;  %s5272_s28 = smov 80   ;;  %v5377_v45 = vld [vmem:[#allocation2 + $0x28] sm:$0xff]  ;;  %vm2336_vm3 = vcmask 97280  }
  0x12   :  { %4792 = vmatpush3.msra.mxu0 %v40_v1  ;;  %4797 = vmatprep.mubr.msk.f32.mxu0 %vm52_vm0, %v36_v5  ;;  %s5273_s29 = smov 112   ;;  %v5382_v50 = vld [vmem:[#allocation2 + $0x20] sm:$0xff]  ;;  %s5274_s30 = smov 48   ;;  %vm2358_vm4 = vcmask 1043456   ;;  %vm4390_vm5 = vcmask 523264  }
  0x13   :  { %4793 = vmatprep.subr.mxu0 %v39_v4  ;;  %s5275_s3 = smov 72   ;;  %s5276_s4 = smov 104  }
  0x14   :  { %4794 = vmatpush3.msra.mxu0 %v39_v4  ;;  %s5277_s5 = smov 40  }
  0x15   :  { %4795 = vmatprep.subr.mxu0 %v38_v8 }
  0x16   :  { %4796 = vmatpush3.msra.mxu0 %v38_v8  ;;  %v5413_v8 = vld [vmem:[#allocation2 + $0x30] sm:$0xff] }
  0x17   :  { %4798 = vmatmul.mubr.msk.f32.vlgmr.msra.gmra.mxu0 %vm52_vm0, %v37_v9  ;;  %4803 = vmatprep.subr.mxu0 %v5265_v10 }
  0x18   :  { %4800 = vmatprep.mubr.msk.f32.mxu0 %vm52_vm0, %v5303_v2 }
  0x1b   :  { %4801 = vmatmul.mubr.msk.f32.gmra.mxu0 %vm52_vm0, %v5315_v6 }
  0x1c   :  { %4805 = vmatprep.mubr.msk.f32.mxu0 %vm5266_vm1, %v5265_v10 }
  0xd7   :  { %v4799_v12 = vpop.f32.mrf.mxu0 }
  0xd8   :  { %v5336_v13 = vadd.f32 %v4799_v12, %v4533_v11 }
  0xd9   :  { %v131_v14 = vpop.f32.mrf.mxu0 }
  0xda   :  { %v5338_v15 = vadd.f32 %v4533_v11, %v131_v14 }
  0xdb   :  { %v4802_v16 = vpop.f32.mrf.mxu0 }
  0xdc   :  { %v5340_v17 = vadd.f32 %v4802_v16, %v4533_v11  ;;  %151 = vrot.lane.b32.xlu0 %v5338_v15, %s5267_s23 }
  0xdd   :  { %v141_v18 = vpop.f32.mrf.mxu0 }
  0xde   :  { %v5344_v19 = vadd.f32 %v4533_v11, %v141_v18 }
  0xe0   :  { %240 = vrot.lane.b32.xlu1 %v5344_v19, %s5268_s24 }
  0xe4   :  { %318 = vrot.lane.b32.xlu1 %v5338_v15, %s5269_s25 }
 0x14e   :  { %v152_v20 = vpop.permute.xlu0 %151 }
 0x14f   :  { %4804 = vmatpush3.xpose.msk.msra.mxu0 %vm153_vm2, %v152_v20 }
 0x150   :  { %4818 = vmatprep.subr.mxu0 %v5265_v10 }
 0x152   :  { %v241_v21 = vpop.permute.xlu1 %240  ;;  %4806 = vmatmul.mubr.msk.f32.vlgmr.msra.gmra.mxu0 %vm153_vm2, %v5338_v15 }
 0x153   :  { %4809 = vmatpush3.msra.mxu1 %v241_v21  ;;  %4820 = vmatprep.mubr.msk.f32.mxu0 %vm5266_vm1, %v5265_v10 }
 0x154   :  { %4813 = vmatprep.subr.mxu1 %v5265_v10 }
 0x156   :  { %v319_v30 = vpop.permute.xlu1 %318 }
 0x212   :  { %v224_v22 = vpop.f32.mrf.mxu0 }
 0x213   :  { %v228_v23 = vsel %vm153_vm2, %v224_v22, -inf }
 0x214   :  { %229 = vmax.xlane.f32.xlu0 %v228_v23  ;;  %v4807_v24 = vpop.f32.mrf.mxu0 }
 0x29d   :  { %v230_v25 = vpop.xlane.xlu0 %229 }
 0x29e   :  { %v231_v26 = vsub.f32 %v224_v22, %v230_v25 }
 0x2a0   :  { %v232_v27 = vmul.f32 1.442695, %v231_v26 }
 0x2a2   :  { %5142 = vpow2.f32 %v232_v27 }
 0x2af   :  { %v5143_v28 = vpop.eup %5142 }
 0x2b0   :  { %v234_v29 = vsel %vm153_vm2, %v5143_v28, 0.0 }
 0x2b1   :  { %235 = vadd.xlane.f32.xlu1 %v234_v29 }
 0x2c2   :  { %316 = vrot.lane.b32.xlu1 %v5338_v15, %s5270_s26 }
 0x33a   :  { %v236_v31 = vpop.xlane.xlu1 %235 }
 0x33b   :  { %5144 = vrcp.f32 %v236_v31 }
 0x33e   :  { %v317_v34 = vpop.permute.xlu1 %316 }
 0x348   :  { %v5145_v32 = vpop.eup %5144 }
 0x349   :  { %v238_v33 = vmul.f32 %v5145_v32, %v5143_v28 }
 0x34b   :  { %4811 = vmatmul.mubr.msk.f32.vlgmr.msra.gmra.mxu1 %vm153_vm2, %v238_v33 }
 0x34c   :  { %4814 = vmatpush3.xpose.msk.msra.mxu1 %vm153_vm2, %v319_v30  ;;  %4815 = vmatprep.mubr.msk.f32.mxu1 %vm5266_vm1, %v5265_v10 }
 0x34d   :  { %4823 = vmatprep.subr.mxu1 %v5265_v10 }
 0x34f   :  { %4816 = vmatmul.mubr.msk.f32.vlgmr.msra.gmra.mxu1 %vm153_vm2, %v317_v34 }
 0x350   :  { %4825 = vmatprep.mubr.msk.f32.mxu1 %vm5266_vm1, %v5265_v10  ;;  %4824 = vmatpush3.msra.mxu1 %v5377_v45 }
 0x351   :  { %4833 = vmatprep.subr.mxu1 %v5265_v10 }
 0x40b   :  { %v312_v35 = vpop.f32.mrf.mxu1 }
 0x40d   :  { %v4812_v36 = vpop.f32.mrf.mxu1 }
 0x40f   :  { %v390_v37 = vpop.f32.mrf.mxu1 }
 0x410   :  { %v394_v38 = vsel %vm153_vm2, %v390_v37, -inf }
 0x411   :  { %395 = vmax.xlane.f32.xlu1 %v394_v38  ;;  %v4817_v39 = vpop.f32.mrf.mxu1  ;;  %v5454_v38 = vld [vmem:[#allocation2 + $0x38] sm:$0xff] }
 0x49a   :  { %v396_v40 = vpop.xlane.xlu1 %395 }
 0x49b   :  { %v397_v41 = vsub.f32 %v390_v37, %v396_v40 }
 0x49d   :  { %v398_v42 = vmul.f32 1.442695, %v397_v41 }
 0x49f   :  { %5146 = vpow2.f32 %v398_v42 }
 0x4ac   :  { %v5147_v43 = vpop.eup %5146 }
 0x4ad   :  { %v400_v44 = vsel %vm153_vm2, %v5147_v43, 0.0 }
 0x4ae   :  { %401 = vadd.xlane.f32.xlu0 %v400_v44 }
 0x4c4   :  { %405 = vrot.lane.b32.xlu0 %v5344_v19, %s5271_s27 }
 0x4c8   :  { %629 = vrot.lane.b32.xlu0 %v5338_v15, %s5272_s28 }
 0x4cc   :  { %627 = vrot.lane.b32.xlu0 %v5338_v15, %s5273_s29 }
 0x537   :  { %v402_v46 = vpop.xlane.xlu0 %401 }
 0x538   :  { %5148 = vrcp.f32 %v402_v46 }
 0x53b   :  { %v406_v47 = vpop.permute.xlu0 %405 }
 0x53c   :  { %4819 = vmatpush3.msra.mxu0 %v406_v47 }
 0x53d   :  { %4828 = vmatprep.subr.mxu0 %v5265_v10 }
 0x53f   :  { %v630_v51 = vpop.permute.xlu0 %629 }
 0x543   :  { %v628_v54 = vpop.permute.xlu0 %627 }
 0x545   :  { %v5149_v48 = vpop.eup %5148 }
 0x546   :  { %v404_v49 = vmul.f32 %v5149_v48, %v5147_v43 }
 0x548   :  { %4821 = vmatmul.mubr.msk.f32.vlgmr.msra.gmra.mxu0 %vm153_vm2, %v404_v49 }
 0x549   :  { %4829 = vmatpush3.msra.mxu0 %v5382_v50  ;;  %4830 = vmatprep.mubr.msk.f32.mxu0 %vm5266_vm1, %v5265_v10 }
 0x54a   :  { %4838 = vmatprep.subr.mxu0 %v5265_v10 }
 0x54c   :  { %4831 = vmatmul.mubr.msk.f32.vlgmr.msra.gmra.mxu0 %vm153_vm2, %v312_v35 }
 0x54d   :  { %4840 = vmatprep.mubr.msk.f32.mxu0 %vm5266_vm1, %v5265_v10 }
 0x608   :  { %v477_v52 = vpop.f32.mrf.mxu0 }
 0x609   :  { %4826 = vmatmul.mubr.msk.f32.vlgmr.msra.gmra.mxu1 %vm153_vm2, %v477_v52 }
 0x60a   :  { %4834 = vmatpush3.xpose.msk.msra.mxu1 %vm153_vm2, %v630_v51  ;;  %v4822_v53 = vpop.f32.mrf.mxu0  ;;  %4835 = vmatprep.mubr.msk.f32.mxu1 %vm5266_vm1, %v5265_v10 }
 0x60b   :  { %4843 = vmatprep.subr.mxu1 %v5265_v10 }
 0x60c   :  { %v5397_v55 = vpop.f32.mrf.mxu0 }
 0x60d   :  { %4836 = vmatmul.mubr.msk.f32.vlgmr.msra.gmra.mxu1 %vm153_vm2, %v628_v54 }
 0x60e   :  { %v4832_v56 = vpop.f32.mrf.mxu0  ;;  %4845 = vmatprep.mubr.msk.f32.mxu1 %vm5266_vm1, %v5265_v10  ;;  %4844 = vmatpush3.msra.mxu1 %v5413_v8 }
 0x60f   :  { %4853 = vmatprep.subr.mxu1 %v5265_v10 }
 0x6c9   :  { %v550_v57 = vpop.f32.mrf.mxu1 }
 0x6ca   :  { %v624_v28 = vadd.f32 %v5397_v55, %v550_v57 }
 0x6cb   :  { %v4827_v58 = vpop.f32.mrf.mxu1 }
 0x6cd   :  { %v701_v59 = vpop.f32.mrf.mxu1 }
 0x6ce   :  { %v705_v60 = vsel %vm153_vm2, %v701_v59, -inf }
 0x6cf   :  { %706 = vmax.xlane.f32.xlu1 %v705_v60  ;;  %v4837_v61 = vpop.f32.mrf.mxu1 }
 0x6e0   :  { %716 = vrot.lane.b32.xlu1 %v5344_v19, %s5274_s30 }
 0x6e4   :  { %868 = vrot.lane.b32.xlu1 %v5338_v15, %s5275_s3 }
 0x6e8   :  { %866 = vrot.lane.b32.xlu1 %v5338_v15, %s5276_s4 }
 0x758   :  { %v707_v62 = vpop.xlane.xlu1 %706 }
 0x759   :  { %v708_v63 = vsub.f32 %v701_v59, %v707_v62 }
 0x75b   :  { %v709_v0 = vmul.f32 1.442695, %v708_v63 }
 0x75c   :  { %v717_v1 = vpop.permute.xlu1 %716 }
 0x75d   :  { %5150 = vpow2.f32 %v709_v0  ;;  %4839 = vmatpush3.msra.mxu0 %v717_v1 }
 0x75e   :  { %4848 = vmatprep.subr.mxu0 %v5265_v10 }
 0x760   :  { %v869_v12 = vpop.permute.xlu1 %868 }
 0x764   :  { %v867_v15 = vpop.permute.xlu1 %866 }
 0x76a   :  { %v5151_v4 = vpop.eup %5150 }
 0x76b   :  { %v711_v5 = vsel %vm153_vm2, %v5151_v4, 0.0 }
 0x76c   :  { %712 = vadd.xlane.f32.xlu0 %v711_v5 }
 0x782   :  { %955 = vrot.lane.b32.xlu0 %v5344_v19, %s5277_s5 }
 0x7f5   :  { %v713_v9 = vpop.xlane.xlu0 %712 }
 0x7f6   :  { %5152 = vrcp.f32 %v713_v9 }
 0x7f9   :  { %v956_v18 = vpop.permute.xlu0 %955 }
 0x803   :  { %v5153_v11 = vpop.eup %5152 }
 0x804   :  { %v715_v14 = vmul.f32 %v5153_v11, %v5151_v4 }
 0x806   :  { %4841 = vmatmul.mubr.msk.f32.vlgmr.msra.gmra.mxu0 %vm153_vm2, %v715_v14 }
 0x807   :  { %4849 = vmatpush3.xpose.msk.msra.mxu0 %vm153_vm2, %v869_v12  ;;  %4850 = vmatprep.mubr.msk.f32.mxu0 %vm5266_vm1, %v5265_v10 }
 0x808   :  { %4858 = vmatprep.subr.mxu0 %v5265_v10 }
 0x80a   :  { %4851 = vmatmul.mubr.msk.f32.vlgmr.msra.gmra.mxu0 %vm153_vm2, %v867_v15 }
 0x80b   :  { %4860 = vmatprep.mubr.msk.f32.mxu0 %vm5266_vm1, %v5265_v10  ;;  %4859 = vmatpush3.msra.mxu0 %v5454_v38 }
 0x80c   :  { %4868 = vmatprep.subr.mxu0 %v5265_v10 }
 0x8c6   :  { %v788_v16 = vpop.f32.mrf.mxu0 }
 0x8c7   :  { %4846 = vmatmul.mubr.msk.f32.vlgmr.msra.gmra.mxu1 %vm153_vm2, %v788_v16 }
 0x8c8   :  { %4854 = vmatpush3.msra.mxu1 %v956_v18  ;;  %v4842_v19 = vpop.f32.mrf.mxu0  ;;  %4855 = vmatprep.mubr.msk.f32.mxu1 %vm5266_vm1, %v5265_v10 }
 0x8c9   :  { %4863 = vmatprep.subr.mxu1 %v5265_v10 }
 0x8ca   :  { %v940_v20 = vpop.f32.mrf.mxu0 }
 0x8cb   :  { %v944_v21 = vsel %vm153_vm2, %v940_v20, -inf }
 0x8cc   :  { %945 = vmax.xlane.f32.xlu1 %v944_v21  ;;  %v4852_v22 = vpop.f32.mrf.mxu0 }
 0x8dd   :  { %1270 = vrot.lane.b32.xlu1 %v5336_v13, %s5270_s26 }
 0x955   :  { %v946_v23 = vpop.xlane.xlu1 %945 }
 0x956   :  { %v947_v24 = vsub.f32 %v940_v20, %v946_v23 }
 0x958   :  { %v948_v25 = vmul.f32 1.442695, %v947_v24 }
 0x959   :  { %v1271_v37 = vpop.permute.xlu1 %1270 }
 0x95a   :  { %5154 = vpow2.f32 %v948_v25 }
 0x967   :  { %v5155_v26 = vpop.eup %5154 }
 0x968   :  { %v950_v27 = vsel %vm153_vm2, %v5155_v26, 0.0 }
 0x969   :  { %951 = vadd.xlane.f32.xlu0 %v950_v27 }
 0x97f   :  { %1106 = vrot.lane.b32.xlu0 %v5336_v13, %s5267_s23 }
 0x983   :  { %1272 = vrot.lane.b32.xlu0 %v5336_v13, %s5269_s25 }
 0x987   :  { %v861_v29 = vpop.f32.mrf.mxu1 }
 0x988   :  { %v865_v30 = vadd.f32 %v861_v29, %v624_v28 }
 0x989   :  { %v4847_v31 = vpop.f32.mrf.mxu1 }
 0x9f2   :  { %v952_v32 = vpop.xlane.xlu0 %951 }
 0x9f3   :  { %5156 = vrcp.f32 %v952_v32 }
 0x9f6   :  { %v1107_v34 = vpop.permute.xlu0 %1106 }
 0x9fa   :  { %v1273_v36 = vpop.permute.xlu0 %1272 }
 0xa00   :  { %v5157_v33 = vpop.eup %5156 }
 0xa01   :  { %v954_v35 = vmul.f32 %v5157_v33, %v5155_v26 }
 0xa03   :  { %4856 = vmatmul.mubr.msk.f32.vlgmr.msra.gmra.mxu1 %vm153_vm2, %v954_v35 }
 0xa04   :  { %4864 = vmatpush3.xpose.msk.msra.mxu1 %vm153_vm2, %v1107_v34  ;;  %4865 = vmatprep.mubr.msk.f32.mxu1 %vm5266_vm1, %v5265_v10 }
 0xa05   :  { %4873 = vmatprep.subr.mxu1 %v5265_v10 }
 0xa07   :  { %4866 = vmatmul.mubr.msk.f32.vlgmr.msra.gmra.mxu1 %vm153_vm2, %v5336_v13 }
 0xa08   :  { %4874 = vmatpush3.xpose.msk.msra.mxu1 %vm153_vm2, %v1273_v36  ;;  %4875 = vmatprep.mubr.msk.f32.mxu1 %vm5266_vm1, %v5265_v10 }
 0xa09   :  { %4883 = vmatprep.subr.mxu1 %v5265_v10 }
 0xa0b   :  { %4876 = vmatmul.mubr.msk.f32.vlgmr.msra.gmra.mxu1 %vm153_vm2, %v1271_v37 }
 0xa0c   :  { %4884 = vmatpush3.msra.mxu1 %v5377_v45  ;;  %4885 = vmatprep.mubr.msk.f32.mxu1 %vm5266_vm1, %v5265_v10 }
 0xa0d   :  { %4893 = vmatprep.subr.mxu1 %v5265_v10 }
 0xac3   :  { %v1027_v39 = vpop.f32.mrf.mxu1 }
 0xac4   :  { %4861 = vmatmul.mubr.msk.f32.vlgmr.msra.gmra.mxu0 %vm153_vm2, %v1027_v39 }
 0xac5   :  { %v4857_v40 = vpop.f32.mrf.mxu1  ;;  %4870 = vmatprep.mubr.msk.f32.mxu0 %vm5266_vm1, %v5265_v10 }
 0xac7   :  { %v1178_v41 = vpop.f32.mrf.mxu1 }
 0xac8   :  { %v1182_v42 = vsel %vm153_vm2, %v1178_v41, -inf }
 0xac9   :  { %1183 = vmax.xlane.f32.xlu0 %v1182_v42  ;;  %v4867_v43 = vpop.f32.mrf.mxu1 }
 0xacb   :  { %v1344_v44 = vpop.f32.mrf.mxu1 }
 0xacc   :  { %v1348_v45 = vsel %vm153_vm2, %v1344_v44, -inf }
 0xacd   :  { %1349 = vmax.xlane.f32.xlu1 %v1348_v45  ;;  %v4877_v46 = vpop.f32.mrf.mxu1 }
 0xade   :  { %1359 = vrot.lane.b32.xlu1 %v5340_v17, %s5271_s27 }
 0xb52   :  { %v1184_v47 = vpop.xlane.xlu0 %1183 }
 0xb53   :  { %v1185_v48 = vsub.f32 %v1178_v41, %v1184_v47 }
 0xb55   :  { %v1186_v49 = vmul.f32 1.442695, %v1185_v48 }
 0xb56   :  { %v1350_v51 = vpop.xlane.xlu1 %1349 }
 0xb57   :  { %5158 = vpow2.f32 %v1186_v49  ;;  %v1351_v52 = vsub.f32 %v1344_v44, %v1350_v51  ;;  %v4570_v44 = vld [vmem:[#allocation2 + $0xe1] ss:$0 sm:$0xff] }
 0xb59   :  { %v1352_v53 = vmul.f32 1.442695, %v1351_v52 }
 0xb5a   :  { %v1360_v4 = vpop.permute.xlu1 %1359 }
 0xb5b   :  { %5160 = vpow2.f32 %v1352_v53 }
 0xb64   :  { %v5159_v54 = vpop.eup %5158 }
 0xb65   :  { %v1188_v55 = vsel %vm153_vm2, %v5159_v54, 0.0 }
 0xb66   :  { %1189 = vadd.xlane.f32.xlu0 %v1188_v55 }
 0xb68   :  { %v5161_v56 = vpop.eup %5160 }
 0xb69   :  { %v1354_v57 = vsel %vm153_vm2, %v5161_v56, 0.0 }
 0xb6a   :  { %1355 = vadd.xlane.f32.xlu0 %v1354_v57 }
 0xb80   :  { %1194 = vrot.lane.b32.xlu0 %v5340_v17, %s5268_s24 }
 0xb84   :  { %1583 = vrot.lane.b32.xlu0 %v5336_v13, %s5272_s28  ;;  %v1100_v58 = vpop.f32.mrf.mxu0 }
 0xb85   :  { %v5471_v59 = vadd.f32 %v1100_v58, %v865_v30 }
 0xb86   :  { %v4862_v60 = vpop.f32.mrf.mxu0 }
 0xb87   :  { %v2063_v45 = vadd.f32 %v4570_v44, %v5471_v59 }
 0xb88   :  { %1581 = vrot.lane.b32.xlu0 %v5336_v13, %s5273_s29 }
 0xb89   :  { %v2065_v48 = vadd.f32 %v2063_v45, %v5303_v2 }
 0xb8b   :  { %v2069_v49 = vsel %vm52_vm0, %v2065_v48, 0.0 }
 0xbef   :  { %v1190_v61 = vpop.xlane.xlu0 %1189 }
 0xbf0   :  { %5162 = vrcp.f32 %v1190_v61 }
 0xbf3   :  { %v1356_v62 = vpop.xlane.xlu0 %1355 }
 0xbf4   :  { %5164 = vrcp.f32 %v1356_v62 }
 0xbf7   :  { %v1195_v63 = vpop.permute.xlu0 %1194 }
 0xbf8   :  { %4869 = vmatpush3.msra.mxu0 %v1195_v63 }
 0xbf9   :  { %4878 = vmatprep.subr.mxu0 %v5265_v10 }
 0xbfb   :  { %v1584_v12 = vpop.permute.xlu0 %1583 }
 0xbfd   :  { %v5163_v0 = vpop.eup %5162 }
 0xbfe   :  { %v1192_v1 = vmul.f32 %v5163_v0, %v5159_v54 }
 0xc00   :  { %4871 = vmatmul.mubr.msk.f32.vlgmr.msra.gmra.mxu0 %vm153_vm2, %v1192_v1 }
 0xc01   :  { %v5165_v5 = vpop.eup %5164  ;;  %4879 = vmatpush3.msra.mxu0 %v1360_v4  ;;  %4880 = vmatprep.mubr.msk.f32.mxu0 %vm5266_vm1, %v5265_v10 }
 0xc02   :  { %v1358_v9 = vmul.f32 %v5165_v5, %v5161_v56  ;;  %4888 = vmatprep.subr.mxu0 %v5265_v10 }
 0xc04   :  { %4881 = vmatmul.mubr.msk.f32.vlgmr.msra.gmra.mxu0 %vm153_vm2, %v1358_v9 }
 0xc05   :  { %4889 = vmatpush3.msra.mxu0 %v5382_v50  ;;  %4890 = vmatprep.mubr.msk.f32.mxu0 %vm5266_vm1, %v5265_v10  ;;  %v1582_v50 = vpop.permute.xlu0 %1581 }
 0xc06   :  { %4898 = vmatprep.subr.mxu0 %v5265_v10 }
 0xcc0   :  { %v1266_v11 = vpop.f32.mrf.mxu0 }
 0xcc1   :  { %4891 = vmatmul.mubr.msk.f32.vlgmr.msra.gmra.mxu0 %vm153_vm2, %v1266_v11 }
 0xcc2   :  { %v4872_v14 = vpop.f32.mrf.mxu0  ;;  %4900 = vmatprep.mubr.msk.f32.mxu0 %vm5266_vm1, %v5265_v10 }
 0xcc4   :  { %v1431_v15 = vpop.f32.mrf.mxu0 }
 0xcc5   :  { %4886 = vmatmul.mubr.msk.f32.vlgmr.msra.gmra.mxu1 %vm153_vm2, %v1431_v15 }
 0xcc6   :  { %4894 = vmatpush3.xpose.msk.msra.mxu1 %vm153_vm2, %v1584_v12  ;;  %v4882_v16 = vpop.f32.mrf.mxu0  ;;  %4895 = vmatprep.mubr.msk.f32.mxu1 %vm5266_vm1, %v5265_v10 }
 0xcc7   :  { %4903 = vmatprep.subr.mxu1 %v5265_v10 }
 0xcc9   :  { %4896 = vmatmul.mubr.msk.f32.vlgmr.msra.gmra.mxu1 %vm153_vm2, %v1582_v50 }
 0xcca   :  { %4904 = vmatpush3.msra.mxu1 %v5413_v8  ;;  %4905 = vmatprep.mubr.msk.f32.mxu1 %vm5266_vm1, %v5265_v10 }
 0xccb   :  { %4913 = vmatprep.subr.mxu1 %v5265_v10 }
 0xd81   :  { %v1577_v18 = vpop.f32.mrf.mxu0 }
 0xd83   :  { %v4892_v19 = vpop.f32.mrf.mxu0 }
 0xd85   :  { %v1504_v20 = vpop.f32.mrf.mxu1 }
 0xd86   :  { %v1578_v21 = vadd.f32 %v1577_v18, %v1504_v20 }
 0xd87   :  { %v4887_v22 = vpop.f32.mrf.mxu1 }
 0xd89   :  { %v1655_v23 = vpop.f32.mrf.mxu1 }
 0xd8a   :  { %v1659_v24 = vsel %vm153_vm2, %v1655_v23, -inf }
 0xd8b   :  { %1660 = vmax.xlane.f32.xlu1 %v1659_v24  ;;  %v4897_v25 = vpop.f32.mrf.mxu1 }
 0xd8c   :  { %v2113_v25 = vld [vmem:[#allocation2 + $0x58] sm:$0xff] }
 0xd9c   :  { %1822 = vrot.lane.b32.xlu1 %v5336_v13, %s5275_s3 }
 0xda0   :  { %1820 = vrot.lane.b32.xlu1 %v5336_v13, %s5276_s4 }
 0xe14   :  { %v1661_v8 = vpop.xlane.xlu1 %1660 }
 0xe15   :  { %v1662_v26 = vsub.f32 %v1655_v23, %v1661_v8  ;;  %v2112_v8 = vld [vmem:[#allocation2 + $0x50] sm:$0xff] }
 0xe17   :  { %v1663_v27 = vmul.f32 1.442695, %v1662_v26  ;;  %v2111_v26 = vld [vmem:[#allocation2 + $0x48] sm:$0xff] }
 0xe18   :  { %v1823_v33 = vpop.permute.xlu1 %1822 }
 0xe19   :  { %5166 = vpow2.f32 %v1663_v27  ;;  %v2110_v27 = vld [vmem:[#allocation2 + $0x40] sm:$0xff] }
 0xe1c   :  { %v1821_v34 = vpop.permute.xlu1 %1820 }
 0xe26   :  { %v5167_v28 = vpop.eup %5166 }
 0xe27   :  { %v1665_v29 = vsel %vm153_vm2, %v5167_v28, 0.0 }
 0xe28   :  { %1666 = vadd.xlane.f32.xlu0 %v1665_v29 }
 0xe3e   :  { %1670 = vrot.lane.b32.xlu0 %v5340_v17, %s5274_s30 }
 0xeb1   :  { %v1667_v30 = vpop.xlane.xlu0 %1666 }
 0xeb2   :  { %5168 = vrcp.f32 %v1667_v30 }
 0xeb5   :  { %v1671_v31 = vpop.permute.xlu0 %1670 }
 0xeb6   :  { %4899 = vmatpush3.msra.mxu0 %v1671_v31 }
 0xeb7   :  { %4908 = vmatprep.subr.mxu0 %v5265_v10 }
 0xebf   :  { %v5169_v32 = vpop.eup %5168 }
 0xec0   :  { %v1669_v13 = vmul.f32 %v5169_v32, %v5167_v28 }
 0xec2   :  { %4901 = vmatmul.mubr.msk.f32.vlgmr.msra.gmra.mxu0 %vm153_vm2, %v1669_v13 }
 0xec3   :  { %4909 = vmatpush3.xpose.msk.msra.mxu0 %vm153_vm2, %v1823_v33  ;;  %4910 = vmatprep.mubr.msk.f32.mxu0 %vm5266_vm1, %v5265_v10 }
 0xec4   :  { %4918 = vmatprep.subr.mxu0 %v5265_v10 }
 0xec6   :  { %4911 = vmatmul.mubr.msk.f32.vlgmr.msra.gmra.mxu0 %vm153_vm2, %v1821_v34  ;;  %v33_v34 = vld [vmem:[%s5900_s0 + $0x38] sm:$0xff] }
 0xec7   :  { %4919 = vmatpush3.msra.mxu0 %v5454_v38  ;;  %4920 = vmatprep.mubr.msk.f32.mxu0 %vm5266_vm1, %v5265_v10 }
 0xec8   :  { %4943 = vmatprep.subr.mxu0 %v5265_v10 }
 0xf82   :  { %v1742_v35 = vpop.f32.mrf.mxu0 }
 0xf83   :  { %4906 = vmatmul.mubr.msk.f32.vlgmr.msra.gmra.mxu1 %vm153_vm2, %v1742_v35  ;;  %v34_v35 = vld [vmem:[%s5900_s0 + $0x40] sm:$0xff] }
 0xf84   :  { %v4902_v36 = vpop.f32.mrf.mxu0  ;;  %4915 = vmatprep.mubr.msk.f32.mxu1 %vm5266_vm1, %v5265_v10 }
 0xf85   :  { %v35_v36 = vld [vmem:[%s5900_s0 + $0x48] sm:$0xff] }
 0xf86   :  { %v1894_v37 = vpop.f32.mrf.mxu0 }
 0xf87   :  { %v1898_v39 = vsel %vm153_vm2, %v1894_v37, -inf }
 0xf88   :  { %1899 = vmax.xlane.f32.xlu0 %v1898_v39  ;;  %v4912_v40 = vpop.f32.mrf.mxu0  ;;  %v31_v39 = vld [vmem:[%s5900_s0 + $0x28] sm:$0xff] }
 0xf89   :  { %v32_v40 = vld [vmem:[%s5900_s0 + $0x30] sm:$0xff] }
 0xf9e   :  { %1909 = vrot.lane.b32.xlu0 %v5340_v17, %s5277_s5 }
0x1011   :  { %v1900_v38 = vpop.xlane.xlu0 %1899 }
0x1012   :  { %v1901_v41 = vsub.f32 %v1894_v37, %v1900_v38 }
0x1014   :  { %v1902_v42 = vmul.f32 1.442695, %v1901_v41  ;;  %v5572_v41 = vld [vmem:[#allocation2 + $0xe2] ss:$0 sm:$0xff] }
0x1015   :  { %v1910_v43 = vpop.permute.xlu0 %1909 }
0x1016   :  { %5170 = vpow2.f32 %v1902_v42  ;;  %4914 = vmatpush3.msra.mxu1 %v1910_v43 }
0x1017   :  { %4923 = vmatprep.subr.mxu1 %v2113_v25 }
0x1023   :  { %v5171_v46 = vpop.eup %5170 }
0x1024   :  { %v1904_v47 = vsel %vm153_vm2, %v5171_v46, 0.0 }
0x1025   :  { %1905 = vadd.xlane.f32.xlu1 %v1904_v47 }
0x1029   :  { %2070 = vadd.xlane.f32.xlu1 %v2069_v49 }
0x1043   :  { %v1815_v51 = vpop.f32.mrf.mxu1 }
0x1044   :  { %v1819_v17 = vadd.f32 %v1815_v51, %v1578_v21  ;;  %v4572_v21 = vld [vmem:[#allocation2 + $0xe7] ss:$0 sm:$0xff] }
0x1045   :  { %v4907_v52 = vpop.f32.mrf.mxu1 }
0x10ae   :  { %v1906_v53 = vpop.xlane.xlu1 %1905 }
0x10af   :  { %5172 = vrcp.f32 %v1906_v53 }
0x10b2   :  { %v2071_v2 = vpop.xlane.xlu1 %2070 }
0x10b3   :  { %v2076_v58 = vmul.f32 0.03125, %v2071_v2 }
0x10b5   :  { %v2078_v62 = vsub.f32 %v2065_v48, %v2076_v58 }
0x10b7   :  { %v2080_v4 = vmul.f32 %v2078_v62, %v2078_v62 }
0x10b9   :  { %v2082_v5 = vsel %vm52_vm0, %v2080_v4, 0.0 }
0x10bc   :  { %v5173_v54 = vpop.eup %5172 }
0x10bd   :  { %v1908_v55 = vmul.f32 %v5173_v54, %v5171_v46 }
0x10bf   :  { %4916 = vmatmul.mubr.msk.f32.vlgmr.msra.gmra.mxu1 %vm153_vm2, %v1908_v55 }
0x10c0   :  { %4924 = vmatpush3.msra.mxu1 %v2113_v25 }
0x10c1   :  { %4925 = vmatprep.subr.mxu1 %v2112_v8 }
0x10c2   :  { %4926 = vmatpush3.msra.mxu1 %v2112_v8 }
0x10c3   :  { %4927 = vmatprep.subr.mxu1 %v2111_v26 }
0x10c4   :  { %4928 = vmatpush3.msra.mxu1 %v2111_v26 }
0x10c5   :  { %4929 = vmatprep.subr.mxu1 %v2110_v27 }
0x10c6   :  { %4930 = vmatpush3.msra.mxu1 %v2110_v27 }
0x10c7   :  { %4964 = vmatprep.subr.mxu1 %v5265_v10 }
0x117f   :  { %v1981_v56 = vpop.f32.mrf.mxu1 }
0x1180   :  { %4921 = vmatmul.mubr.msk.f32.vlgmr.msra.gmra.mxu0 %vm153_vm2, %v1981_v56 }
0x1181   :  { %v4917_v57 = vpop.f32.mrf.mxu1  ;;  %4947 = vmatprep.mubr.msk.f32.mxu0 %vm5266_vm1, %v5265_v10 }
0x1240   :  { %v2054_v59 = vpop.f32.mrf.mxu0 }
0x1241   :  { %v2058_v60 = vadd.f32 %v2054_v59, %v1819_v17 }
0x1242   :  { %v4922_v61 = vpop.f32.mrf.mxu0 }
0x1243   :  { %v2064_v63 = vadd.f32 %v4570_v44, %v2058_v60 }
0x1245   :  { %v2066_v0 = vadd.f32 %v2064_v63, %v5315_v6  ;;  %v4571_v6 = vld [vmem:[#allocation2 + $0xe6] ss:$0 sm:$0xff] }
0x1247   :  { %v2072_v1 = vsel %vm52_vm0, %v2066_v0, 0.0 }
0x1248   :  { %2073 = vadd.xlane.f32.xlu1 %v2072_v1 }
0x124c   :  { %2083 = vadd.xlane.f32.xlu1 %v2082_v5 }
0x12d1   :  { %v2074_v9 = vpop.xlane.xlu1 %2073 }
0x12d2   :  { %v2077_v11 = vmul.f32 0.03125, %v2074_v9 }
0x12d4   :  { %v2079_v12 = vsub.f32 %v2066_v0, %v2077_v11 }
0x12d5   :  { %v2084_v14 = vpop.xlane.xlu1 %2083 }
0x12d6   :  { %v2088_v15 = vmul.f32 0.03125, %v2084_v14  ;;  %v2081_v16 = vmul.f32 %v2079_v12, %v2079_v12 }
0x12d8   :  { %v2090_v50 = vadd.f32 1e-05, %v2088_v15  ;;  %v2085_v18 = vsel %vm52_vm0, %v2081_v16, 0.0 }
0x12d9   :  { %2086 = vadd.xlane.f32.xlu1 %v2085_v18 }
0x12da   :  { %5174 = vrsqrt.f32 %v2090_v50 }
0x12e7   :  { %v5175_v19 = vpop.eup %5174 }
0x12e8   :  { %v2094_v20 = vmul.f32 %v5175_v19, %v2078_v62 }
0x12ea   :  { %v2100_v22 = vmul.f32 %v4571_v6, %v2094_v20 }
0x12ec   :  { %v5535_v23 = vadd.f32 %v4572_v21, %v2100_v22 }
0x12ee   :  { %v2108_v24 = vadd.f32 %v5535_v23, %v5308_v3 }
0x12f0   :  { %4931 = vmatprep.mubr.msk.f32.mxu1 %vm52_vm0, %v2108_v24  ;;  %v5652_v24 = vld [vmem:[#allocation2 + $0x68] sm:$0xff] }
0x1362   :  { %v2087_v28 = vpop.xlane.xlu1 %2086 }
0x1363   :  { %v2089_v29 = vmul.f32 0.03125, %v2087_v28  ;;  %v5657_v28 = vld [vmem:[#allocation2 + $0x60] sm:$0xff] }
0x1365   :  { %v2091_v30 = vadd.f32 1e-05, %v2089_v29 }
0x1367   :  { %5176 = vrsqrt.f32 %v2091_v30 }
0x1374   :  { %v5177_v3 = vpop.eup %5176 }
0x1375   :  { %v2095_v31 = vmul.f32 %v5177_v3, %v2079_v12 }
0x1377   :  { %v2101_v32 = vmul.f32 %v4571_v6, %v2095_v31 }
0x1379   :  { %v5541_v33 = vadd.f32 %v4572_v21, %v2101_v32 }
0x137b   :  { %v2109_v13 = vadd.f32 %v5541_v33, %v5320_v7  ;;  %v30_v7 = vld [vmem:[%s5900_s0 + $0x20] sm:$0xff]  ;;  %s5278_s0 = smov [#allocation5]  }
0x137c   :  { %s4521_s1 = sshll.u32 %s5278_s0, 4  ;;  %s4522_s1 = int_to_ptr.vmem [resolvable:$true] %s4521_s1 }
0x137d   :  { %4932 = vmatmul.mubr.msk.f32.vlgmr.msra.gmra.mxu1 %vm52_vm0, %v2109_v13  ;;  %s5238_s20 = scalar_lea.vmem %s4522_s1, 256  ;;  %p5243_p6 = scmp.lt.s32.totalorder %s4522_s1, %s4522_s1 }
0x137e   :  { %4934 = vmatprep.mubr.msk.f32.mxu1 %vm52_vm0, %v33_v34  ;;  %p5239_p5 = scmp.ne.s32.totalorder %s4522_s1, %s5238_s20  ;;  %p5244_p7 = scmp.lt.s32.totalorder %s5238_s20, %s5238_s20 }
0x1380   :  { %p5245_p8 = por %p5244_p7, %p5243_p6 }
0x1381   :  { %4935 = vmatmul.mubr.msk.f32.gmra.mxu1 %vm52_vm0, %v34_v35 }
0x1382   :  { %4937 = vmatprep.mubr.msk.f32.mxu1 %vm52_vm0, %v35_v36  ;;  %p5246_p9 = pnand %p5245_p8, %p5239_p5 }
0x1385   :  { %4938 = vmatmul.mubr.msk.f32.gmra.mxu1 %vm52_vm0, %v30_v7 }
0x1386   :  { %4940 = vmatprep.mubr.msk.f32.mxu1 %vm52_vm0, %v31_v39 }
0x1389   :  { %4941 = vmatmul.mubr.msk.f32.gmra.mxu1 %vm52_vm0, %v32_v40 }
0x138a   :  { %4968 = vmatprep.mubr.msk.f32.mxu1 %vm5266_vm1, %v5265_v10 }
0x143d   :  { %v5562_v37 = vpop.f32.mrf.mxu1 }
0x143f   :  { %v2214_v38 = vpop.f32.mrf.mxu1 }
0x1440   :  { %v5590_v48 = vadd.f32 %v5572_v41, %v2214_v38 }
0x1441   :  { %v4936_v42 = vpop.f32.mrf.mxu1 }
0x1442   :  { %v5577_v43 = vadd.f32 %v4936_v42, %v5572_v41 }
0x1443   :  { %v2224_v44 = vpop.f32.mrf.mxu1 }
0x1444   :  { %v5580_v45 = vadd.f32 %v5572_v41, %v2224_v44  ;;  %2257 = vrot.lane.b32.xlu0 %v5577_v43, %s5267_s23 }
0x1445   :  { %v4939_v52 = vpop.f32.mrf.mxu1 }
0x1446   :  { %2255 = vrot.lane.b32.xlu1 %v5580_v45, %s5267_s23  ;;  %v5617_v62 = vadd.f32 %v4939_v52, %v5572_v41 }
0x1447   :  { %v5598_v53 = vpop.f32.mrf.mxu1 }
0x1449   :  { %v5600_v54 = vpop.f32.mrf.mxu1 }
0x144b   :  { %v2244_v55 = vpop.f32.mrf.mxu1 }
0x144c   :  { %v5603_v56 = vadd.f32 %v5572_v41, %v2244_v55 }
0x14b6   :  { %v2258_v46 = vpop.permute.xlu0 %2257 }
0x14b7   :  { %4944 = vmatpush3.xpose.msk.msra.mxu0 %vm153_vm2, %v2258_v46 }
0x14b8   :  { %4945 = vmatprep.subr.mxu0 %v5265_v10  ;;  %v2256_v47 = vpop.permute.xlu1 %2255 }
0x14bb   :  { %4946 = vmatpush3.xpose.msk.msra.mxu0 %vm153_vm2, %v2256_v47  ;;  %v2235_v47 = vadd.f32 %v5572_v41, %v5598_v53 }
0x14bc   :  { %4950 = vmatprep.subr.mxu0 %v5265_v10 }
0x14be   :  { %4948 = vmatmul.mubr.msk.f32.vlgmr.msra.gmra.mxu0 %vm153_vm2, %v5590_v48 }
0x14bf   :  { %4954 = vmatprep.mubr.msk.f32.mxu0 %vm5266_vm1, %v5265_v10 }
0x157e   :  { %v2332_v49 = vpop.f32.mrf.mxu0 }
0x157f   :  { %v2337_v51 = vsel %vm2336_vm3, %v2332_v49, -inf }
0x1580   :  { %2338 = vmax.xlane.f32.xlu0 %v2337_v51  ;;  %v4949_v17 = vpop.f32.mrf.mxu0 }
0x1596   :  { %2352 = vrot.lane.b32.xlu0 %v5603_v56, %s5268_s24 }
0x159a   :  { %2435 = vrot.lane.b32.xlu0 %v5577_v43, %s5269_s25 }
0x159e   :  { %2433 = vrot.lane.b32.xlu0 %v5580_v45, %s5269_s25 }
0x15a2   :  { %2431 = vrot.lane.b32.xlu0 %v5590_v48, %s5270_s26 }
0x1609   :  { %v2339_v57 = vpop.xlane.xlu0 %2338 }
0x160a   :  { %v2340_v2 = vsub.f32 %v2332_v49, %v2339_v57 }
0x160c   :  { %v2341_v58 = vmul.f32 1.442695, %v2340_v2 }
0x160d   :  { %v2353_v59 = vpop.permute.xlu0 %2352 }
0x160e   :  { %5178 = vpow2.f32 %v2341_v58  ;;  %4951 = vmatpush3.msk.msra.mxu0 %vm2358_vm4, %v2353_v59  ;;  %v3245_v58 = vrot.slane %v5577_v43, 4 }
0x160f   :  { %4952 = vmatprep.subr.mxu0 %v5265_v10 }
0x1611   :  { %v2436_v1 = vpop.permute.xlu0 %2435 }
0x1615   :  { %v2434_v9 = vpop.permute.xlu0 %2433 }
0x1619   :  { %v2432_v11 = vpop.permute.xlu0 %2431 }
0x161b   :  { %v5179_v60 = vpop.eup %5178 }
0x161c   :  { %v2343_v61 = vsel %vm2336_vm3, %v5179_v60, 0.0 }
0x161d   :  { %2344 = vadd.xlane.f32.xlu1 %v2343_v61 }
0x162e   :  { %2350 = vrot.lane.b32.xlu1 %v5617_v62, %s5268_s24 }
0x16a6   :  { %v2345_v63 = vpop.xlane.xlu1 %2344 }
0x16a7   :  { %5180 = vrcp.f32 %v2345_v63 }
0x16aa   :  { %v2351_v0 = vpop.permute.xlu1 %2350 }
0x16ab   :  { %4953 = vmatpush3.msra.mxu0 %v2351_v0 }
0x16ac   :  { %4957 = vmatprep.subr.mxu0 %v5265_v10 }
0x16b4   :  { %v5181_v4 = vpop.eup %5180 }
0x16b5   :  { %v2347_v5 = vmul.f32 %v5181_v4, %v5179_v60  ;;  %v2250_v4 = vadd.f32 %v5600_v54, %v5572_v41 }
0x16b7   :  { %4955 = vmatmul.mubr.msk.f32.vlgmr.msra.gmra.mxu0 %vm2336_vm3, %v2347_v5  ;;  %v5717_v5 = vrot.slane %v2250_v4, 4 }
0x16b8   :  { %4958 = vmatpush3.xpose.msk.msra.mxu0 %vm153_vm2, %v2436_v1  ;;  %4961 = vmatprep.mubr.msk.f32.mxu0 %vm5266_vm1, %v5265_v10 }
0x16b9   :  { %4959 = vmatprep.subr.mxu0 %v5265_v10 }
0x16bc   :  { %4960 = vmatpush3.xpose.msk.msra.mxu0 %vm153_vm2, %v2434_v9 }
0x16bd   :  { %4971 = vmatprep.subr.mxu0 %v5265_v10 }
0x16bf   :  { %4962 = vmatmul.mubr.msk.f32.vlgmr.msra.gmra.mxu0 %vm153_vm2, %v2432_v11 }
0x16c0   :  { %4973 = vmatprep.mubr.msk.f32.mxu0 %vm5266_vm1, %v5265_v10  ;;  %4972 = vmatpush3.msra.mxu0 %v5652_v24 }
0x16c1   :  { %4981 = vmatprep.subr.mxu0 %v5265_v10 }
0x1777   :  { %v2427_v12 = vpop.f32.mrf.mxu0 }
0x1779   :  { %v4956_v14 = vpop.f32.mrf.mxu0 }
0x177f   :  { %v2509_v15 = vpop.f32.mrf.mxu0 }
0x1780   :  { %v2513_v16 = vsel %vm2336_vm3, %v2509_v15, -inf }
0x1781   :  { %2514 = vmax.xlane.f32.xlu0 %v2513_v16  ;;  %v4963_v50 = vpop.f32.mrf.mxu0 }
0x1797   :  { %2526 = vrot.lane.b32.xlu0 %v5603_v56, %s5271_s27 }
0x179b   :  { %2754 = vrot.lane.b32.xlu0 %v5577_v43, %s5272_s28 }
0x179f   :  { %2750 = vrot.lane.b32.xlu0 %v5590_v48, %s5273_s29 }
0x17a3   :  { %2999 = vrot.lane.b32.xlu0 %v5580_v45, %s5275_s3 }
0x180a   :  { %v2515_v18 = vpop.xlane.xlu0 %2514 }
0x180b   :  { %v2516_v19 = vsub.f32 %v2509_v15, %v2515_v18  ;;  %v5742_v15 = vld [vmem:[#allocation2 + $0x70] sm:$0xff] }
0x180d   :  { %v2517_v6 = vmul.f32 1.442695, %v2516_v19 }
0x180e   :  { %v2527_v20 = vpop.permute.xlu0 %2526 }
0x180f   :  { %5182 = vpow2.f32 %v2517_v6  ;;  %4965 = vmatpush3.msk.msra.mxu1 %vm2358_vm4, %v2527_v20 }
0x1810   :  { %4966 = vmatprep.subr.mxu1 %v5265_v10 }
0x1812   :  { %v2755_v30 = vpop.permute.xlu0 %2754 }
0x1816   :  { %v2751_v34 = vpop.permute.xlu0 %2750 }
0x181a   :  { %v3000_v36 = vpop.permute.xlu0 %2999 }
0x181c   :  { %v5183_v21 = vpop.eup %5182 }
0x181d   :  { %v2519_v22 = vsel %vm2336_vm3, %v5183_v21, 0.0 }
0x181e   :  { %2520 = vadd.xlane.f32.xlu1 %v2519_v22 }
0x182f   :  { %2524 = vrot.lane.b32.xlu1 %v5617_v62, %s5271_s27 }
0x1833   :  { %2752 = vrot.lane.b32.xlu1 %v5580_v45, %s5272_s28 }
0x1837   :  { %3001 = vrot.lane.b32.xlu1 %v5577_v43, %s5275_s3  ;;  %v3341_v43 = vrot.slane %v5603_v56, 4 }
0x1839   :  { %v5724_v9 = vsel %vm2358_vm4, %v3341_v43, %v5717_v5 }
0x183b   :  { %2997 = vrot.lane.b32.xlu1 %v5590_v48, %s5276_s4  ;;  %v5693_v48 = vrot.slane %v2235_v47, 4 }
0x183d   :  { %v5710_v59 = vsel %vm2358_vm4, %v3245_v58, %v5693_v48 }
0x18a7   :  { %v2521_v25 = vpop.xlane.xlu1 %2520 }
0x18a8   :  { %5184 = vrcp.f32 %v2521_v25  ;;  %v5762_v25 = vld [vmem:[#allocation2 + $0x78] sm:$0xff] }
0x18ab   :  { %v2525_v8 = vpop.permute.xlu1 %2524 }
0x18ac   :  { %4967 = vmatpush3.msra.mxu1 %v2525_v8 }
0x18ad   :  { %4976 = vmatprep.subr.mxu1 %v5265_v10 }
0x18af   :  { %v2753_v31 = vpop.permute.xlu1 %2752 }
0x18b3   :  { %v3002_v35 = vpop.permute.xlu1 %3001 }
0x18b5   :  { %v5185_v26 = vpop.eup %5184 }
0x18b6   :  { %v2523_v27 = vmul.f32 %v5185_v26, %v5183_v21 }
0x18b7   :  { %v2998_v7 = vpop.permute.xlu1 %2997 }
0x18b8   :  { %4969 = vmatmul.mubr.msk.f32.vlgmr.msra.gmra.mxu1 %vm2336_vm3, %v2523_v27 }
0x18b9   :  { %4977 = vmatpush3.msra.mxu1 %v5657_v28  ;;  %4978 = vmatprep.mubr.msk.f32.mxu1 %vm5266_vm1, %v5265_v10 }
0x18ba   :  { %4988 = vmatprep.subr.mxu1 %v5265_v10 }
0x18bc   :  { %4979 = vmatmul.mubr.msk.f32.vlgmr.msra.gmra.mxu1 %vm153_vm2, %v2427_v12 }
0x18bd   :  { %4992 = vmatprep.mubr.msk.f32.mxu1 %vm5266_vm1, %v5265_v10 }
0x1978   :  { %v2600_v29 = vpop.f32.mrf.mxu1 }
0x1979   :  { %4974 = vmatmul.mubr.msk.f32.vlgmr.msra.gmra.mxu0 %vm153_vm2, %v2600_v29 }
0x197a   :  { %4982 = vmatpush3.xpose.msk.msra.mxu0 %vm153_vm2, %v2755_v30  ;;  %v4970_v3 = vpop.f32.mrf.mxu1  ;;  %4985 = vmatprep.mubr.msk.f32.mxu0 %vm5266_vm1, %v5265_v10 }
0x197b   :  { %4983 = vmatprep.subr.mxu0 %v5265_v10 }
0x197c   :  { %v5672_v32 = vpop.f32.mrf.mxu1 }
0x197e   :  { %4984 = vmatpush3.xpose.msk.msra.mxu0 %vm153_vm2, %v2753_v31  ;;  %v4980_v13 = vpop.f32.mrf.mxu1 }
0x197f   :  { %5000 = vmatprep.subr.mxu0 %v5265_v10 }
0x1981   :  { %4986 = vmatmul.mubr.msk.f32.vlgmr.msra.gmra.mxu0 %vm153_vm2, %v2751_v34 }
0x1982   :  { %5001 = vmatpush3.xpose.msk.msra.mxu0 %vm153_vm2, %v3002_v35  ;;  %5004 = vmatprep.mubr.msk.f32.mxu0 %vm5266_vm1, %v5265_v10 }
0x1983   :  { %5002 = vmatprep.subr.mxu0 %v5265_v10 }
0x1986   :  { %5003 = vmatpush3.xpose.msk.msra.mxu0 %vm153_vm2, %v3000_v36 }
0x1987   :  { %5019 = vmatprep.subr.mxu0 %v5265_v10 }
0x1989   :  { %5005 = vmatmul.mubr.msk.f32.vlgmr.msra.gmra.mxu0 %vm153_vm2, %v2998_v7 }
0x198a   :  { %5023 = vmatprep.mubr.msk.f32.mxu0 %vm5266_vm1, %v5265_v10 }
0x1a39   :  { %v5686_v39 = vpop.f32.mrf.mxu0 }
0x1a3a   :  { %v2747_v3 = vadd.f32 %v5672_v32, %v5686_v39 }
0x1a3b   :  { %v4975_v40 = vpop.f32.mrf.mxu0 }
0x1a41   :  { %v2828_v38 = vpop.f32.mrf.mxu0 }
0x1a42   :  { %v2832_v42 = vsel %vm2336_vm3, %v2828_v38, -inf }
0x1a43   :  { %2833 = vmax.xlane.f32.xlu0 %v2832_v42  ;;  %v4987_v44 = vpop.f32.mrf.mxu0 }
0x1a49   :  { %v3075_v45 = vpop.f32.mrf.mxu0 }
0x1a4a   :  { %v3079_v49 = vsel %vm2336_vm3, %v3075_v45, -inf }
0x1a4b   :  { %v5006_v46 = vpop.f32.mrf.mxu0 }
0x1a59   :  { %2845 = vrot.lane.b32.xlu0 %v5603_v56, %s5274_s30 }
0x1a5d   :  { %3250 = vrot.lane.b32.xlu0 %v5693_v48, %s5267_s23 }
0x1a7c   :  { %3080 = vmax.xlane.f32.xlu0 %v3079_v49 }
0x1a92   :  { %3092 = vrot.lane.b32.xlu0 %v5603_v56, %s5277_s5  ;;  %v5732_v56 = vadd.f32 %v5562_v37, %v5572_v41 }
0x1acc   :  { %v2834_v51 = vpop.xlane.xlu0 %2833 }
0x1acd   :  { %v2835_v17 = vsub.f32 %v2828_v38, %v2834_v51 }
0x1acf   :  { %v2836_v52 = vmul.f32 1.442695, %v2835_v17 }
0x1ad0   :  { %v2846_v55 = vpop.permute.xlu0 %2845 }
0x1ad1   :  { %5186 = vpow2.f32 %v2836_v52  ;;  %4989 = vmatpush3.msk.msra.mxu1 %vm2358_vm4, %v2846_v55 }
0x1ad2   :  { %4990 = vmatprep.subr.mxu1 %v5265_v10 }
0x1ad4   :  { %v3251_v53 = vpop.permute.xlu0 %3250 }
0x1ad5   :  { %5020 = vmatpush3.xpose.msk.msra.mxu0 %vm153_vm2, %v3251_v53 }
0x1ad6   :  { %5021 = vmatprep.subr.mxu0 %v5265_v10 }
0x1ade   :  { %v5187_v57 = vpop.eup %5186 }
0x1adf   :  { %v2838_v2 = vsel %vm2336_vm3, %v5187_v57, 0.0 }
0x1ae0   :  { %2839 = vadd.xlane.f32.xlu1 %v2838_v2 }
0x1af1   :  { %2843 = vrot.lane.b32.xlu1 %v5617_v62, %s5274_s30 }
0x1af5   :  { %3248 = vrot.lane.b32.xlu1 %v5710_v59, %s5267_s23 }
0x1b05   :  { %v3081_v60 = vpop.xlane.xlu0 %3080 }
0x1b06   :  { %v3082_v61 = vsub.f32 %v3075_v45, %v3081_v60 }
0x1b08   :  { %v3083_v63 = vmul.f32 1.442695, %v3082_v61 }
0x1b09   :  { %v3093_v6 = vpop.permute.xlu0 %3092 }
0x1b0a   :  { %5188 = vpow2.f32 %v3083_v63 }
0x1b17   :  { %v5189_v0 = vpop.eup %5188 }
0x1b18   :  { %v3085_v1 = vsel %vm2336_vm3, %v5189_v0, 0.0 }
0x1b19   :  { %3086 = vadd.xlane.f32.xlu1 %v3085_v1 }
0x1b2a   :  { %3090 = vrot.lane.b32.xlu1 %v5617_v62, %s5277_s5 }
0x1b2e   :  { %3344 = vrot.lane.b32.xlu1 %v5724_v9, %s5268_s24 }
0x1b69   :  { %v2840_v11 = vpop.xlane.xlu1 %2839 }
0x1b6a   :  { %5190 = vrcp.f32 %v2840_v11 }
0x1b6d   :  { %v2844_v12 = vpop.permute.xlu1 %2843 }
0x1b6e   :  { %4991 = vmatpush3.msra.mxu1 %v2844_v12 }
0x1b6f   :  { %4995 = vmatprep.subr.mxu1 %v5265_v10 }
0x1b71   :  { %v3249_v54 = vpop.permute.xlu1 %3248 }
0x1b72   :  { %5022 = vmatpush3.xpose.msk.msra.mxu0 %vm153_vm2, %v3249_v54 }
0x1b73   :  { %5040 = vmatprep.subr.mxu0 %v5265_v10 }
0x1b75   :  { %5024 = vmatmul.mubr.msk.f32.vlgmr.msra.gmra.mxu0 %vm153_vm2, %v5732_v56 }
0x1b76   :  { %5044 = vmatprep.mubr.msk.f32.mxu0 %vm5266_vm1, %v5265_v10 }
0x1b77   :  { %v5191_v62 = vpop.eup %5190 }
0x1b78   :  { %v2842_v14 = vmul.f32 %v5191_v62, %v5187_v57 }
0x1b7a   :  { %4993 = vmatmul.mubr.msk.f32.vlgmr.msra.gmra.mxu1 %vm2336_vm3, %v2842_v14 }
0x1b7b   :  { %4997 = vmatprep.mubr.msk.f32.mxu1 %vm5266_vm1, %v5265_v10  ;;  %4996 = vmatpush3.msra.mxu1 %v5742_v15 }
0x1b7c   :  { %5007 = vmatprep.subr.mxu1 %v5265_v10 }
0x1ba2   :  { %v3087_v37 = vpop.xlane.xlu1 %3086 }
0x1ba3   :  { %5192 = vrcp.f32 %v3087_v37 }
0x1ba6   :  { %v3091_v21 = vpop.permute.xlu1 %3090 }
0x1baa   :  { %v3345_v40 = vpop.permute.xlu1 %3344 }
0x1bb0   :  { %v5193_v18 = vpop.eup %5192 }
0x1bb1   :  { %v3089_v22 = vmul.f32 %v5193_v18, %v5189_v0 }
0x1c35   :  { %v3325_v41 = vpop.f32.mrf.mxu0 }
0x1c36   :  { %v3329_v16 = vsel %vm2336_vm3, %v3325_v41, -inf }
0x1c37   :  { %3330 = vmax.xlane.f32.xlu0 %v3329_v16  ;;  %v5025_v50 = vpop.f32.mrf.mxu0 }
0x1c3a   :  { %v2919_v19 = vpop.f32.mrf.mxu1 }
0x1c3b   :  { %4998 = vmatmul.mubr.msk.f32.vlgmr.msra.gmra.mxu1 %vm153_vm2, %v2919_v19 }
0x1c3c   :  { %5008 = vmatpush3.msk.msra.mxu1 %vm2358_vm4, %v3093_v6  ;;  %v4994_v20 = vpop.f32.mrf.mxu1  ;;  %5011 = vmatprep.mubr.msk.f32.mxu1 %vm5266_vm1, %v5265_v10 }
0x1c3d   :  { %5009 = vmatprep.subr.mxu1 %v5265_v10 }
0x1c3e   :  { %5010 = vmatpush3.msra.mxu1 %v3091_v21  ;;  %v5844_v21 = vld [vmem:[#allocation2 + $0xe3] ss:$0 sm:$0xff] }
0x1c3f   :  { %5012 = vmatmul.mubr.msk.f32.vlgmr.msra.gmra.mxu1 %vm2336_vm3, %v3089_v22  ;;  %5014 = vmatprep.subr.mxu1 %v5265_v10 }
0x1c40   :  { %5016 = vmatprep.mubr.msk.f32.mxu1 %vm5266_vm1, %v5265_v10  ;;  %5015 = vmatpush3.msra.mxu1 %v5762_v25 }
0x1c41   :  { %5026 = vmatprep.subr.mxu1 %v5265_v10 }
0x1c4d   :  { %3346 = vrot.lane.b32.xlu0 %v5717_v5, %s5268_s24 }
0x1c51   :  { %3428 = vrot.lane.b32.xlu0 %v5693_v48, %s5269_s25 }
0x1c55   :  { %3424 = vrot.lane.b32.xlu0 %v5732_v56, %s5270_s26 }
0x1cc0   :  { %v3331_v8 = vpop.xlane.xlu0 %3330 }
0x1cc1   :  { %v3332_v26 = vsub.f32 %v3325_v41, %v3331_v8 }
0x1cc3   :  { %v3333_v27 = vmul.f32 1.442695, %v3332_v26 }
0x1cc4   :  { %v3347_v36 = vpop.permute.xlu0 %3346 }
0x1cc5   :  { %5194 = vpow2.f32 %v3333_v27 }
0x1cc8   :  { %v3429_v42 = vpop.permute.xlu0 %3428 }
0x1ccc   :  { %v3425_v45 = vpop.permute.xlu0 %3424 }
0x1cd2   :  { %v5195_v29 = vpop.eup %5194 }
0x1cd3   :  { %v3335_v30 = vsel %vm2336_vm3, %v5195_v29, 0.0 }
0x1cd4   :  { %3336 = vadd.xlane.f32.xlu1 %v3335_v30 }
0x1ce5   :  { %3426 = vrot.lane.b32.xlu1 %v5710_v59, %s5269_s25 }
0x1cfb   :  { %v2992_v31 = vpop.f32.mrf.mxu1 }
0x1cfc   :  { %v2996_v13 = vadd.f32 %v2992_v31, %v2747_v3 }
0x1cfd   :  { %v4999_v34 = vpop.f32.mrf.mxu1 }
0x1cff   :  { %v3166_v35 = vpop.f32.mrf.mxu1 }
0x1d00   :  { %5017 = vmatmul.mubr.msk.f32.vlgmr.msra.gmra.mxu1 %vm153_vm2, %v3166_v35 }
0x1d01   :  { %5027 = vmatpush3.msk.msra.mxu1 %vm2358_vm4, %v3347_v36  ;;  %v5013_v7 = vpop.f32.mrf.mxu1  ;;  %5030 = vmatprep.mubr.msk.f32.mxu1 %vm5266_vm1, %v5265_v10 }
0x1d02   :  { %5028 = vmatprep.subr.mxu1 %v5265_v10 }
0x1d03   :  { %5029 = vmatpush3.msra.mxu1 %v3345_v40 }
0x1d04   :  { %5033 = vmatprep.subr.mxu1 %v5265_v10 }
0x1d5d   :  { %v3337_v32 = vpop.xlane.xlu1 %3336 }
0x1d5e   :  { %5196 = vrcp.f32 %v3337_v32 }
0x1d61   :  { %v3427_v44 = vpop.permute.xlu1 %3426 }
0x1d6b   :  { %v5197_v39 = vpop.eup %5196 }
0x1d6c   :  { %v3339_v38 = vmul.f32 %v5197_v39, %v5195_v29 }
0x1d6e   :  { %5031 = vmatmul.mubr.msk.f32.vlgmr.msra.gmra.mxu1 %vm2336_vm3, %v3339_v38 }
0x1d6f   :  { %5034 = vmatpush3.xpose.msk.msra.mxu1 %vm153_vm2, %v3429_v42  ;;  %5037 = vmatprep.mubr.msk.f32.mxu1 %vm5266_vm1, %v5265_v10 }
0x1d70   :  { %5035 = vmatprep.subr.mxu1 %v5265_v10 }
0x1d73   :  { %5036 = vmatpush3.xpose.msk.msra.mxu1 %vm153_vm2, %v3427_v44 }
0x1d74   :  { %5052 = vmatprep.subr.mxu1 %v5265_v10 }
0x1d76   :  { %5038 = vmatmul.mubr.msk.f32.vlgmr.msra.gmra.mxu1 %vm153_vm2, %v3425_v45 }
0x1d77   :  { %5053 = vmatpush3.msra.mxu1 %v5657_v28  ;;  %5054 = vmatprep.mubr.msk.f32.mxu1 %vm5266_vm1, %v5265_v10 }
0x1d78   :  { %5064 = vmatprep.subr.mxu1 %v5265_v10 }
0x1dc0   :  { %v3239_v46 = vpop.f32.mrf.mxu1 }
0x1dc1   :  { %v5789_v47 = vadd.f32 %v3239_v46, %v2996_v13 }
0x1dc2   :  { %v5018_v49 = vpop.f32.mrf.mxu1 }
0x1dc3   :  { %v4241_v22 = vadd.f32 %v5844_v21, %v5789_v47 }
0x1dc5   :  { %v4243_v8 = vadd.f32 %v4241_v22, %v5535_v23 }
0x1dc7   :  { %v4247_v26 = vsel %vm52_vm0, %v4243_v8, 0.0 }
0x1e2e   :  { %v3420_v51 = vpop.f32.mrf.mxu1 }
0x1e2f   :  { %5055 = vmatmul.mubr.msk.f32.vlgmr.msra.gmra.mxu1 %vm153_vm2, %v3420_v51 }
0x1e30   :  { %v5032_v17 = vpop.f32.mrf.mxu1  ;;  %5068 = vmatprep.mubr.msk.f32.mxu1 %vm5266_vm1, %v5265_v10 }
0x1e36   :  { %v3502_v52 = vpop.f32.mrf.mxu1 }
0x1e37   :  { %v3506_v55 = vsel %vm2336_vm3, %v3502_v52, -inf }
0x1e38   :  { %3507 = vmax.xlane.f32.xlu1 %v3506_v55  ;;  %v5039_v28 = vpop.f32.mrf.mxu1 }
0x1e49   :  { %3517 = vrot.lane.b32.xlu1 %v5724_v9, %s5271_s27 }
0x1e4d   :  { %3747 = vrot.lane.b32.xlu1 %v5693_v48, %s5272_s28 }
0x1e51   :  { %3743 = vrot.lane.b32.xlu1 %v5732_v56, %s5273_s29 }
0x1e55   :  { %3992 = vrot.lane.b32.xlu1 %v5710_v59, %s5275_s3 }
0x1ec1   :  { %v3508_v53 = vpop.xlane.xlu1 %3507 }
0x1ec2   :  { %v3509_v57 = vsub.f32 %v3502_v52, %v3508_v53 }
0x1ec4   :  { %v3510_v2 = vmul.f32 1.442695, %v3509_v57 }
0x1ec5   :  { %v3518_v4 = vpop.permute.xlu1 %3517 }
0x1ec6   :  { %5198 = vpow2.f32 %v3510_v2 }
0x1ec9   :  { %v3748_v11 = vpop.permute.xlu1 %3747 }
0x1ed3   :  { %v5199_v58 = vpop.eup %5198 }
0x1ed4   :  { %v3512_v60 = vsel %vm2336_vm3, %v5199_v58, 0.0 }
0x1ed5   :  { %3513 = vadd.xlane.f32.xlu0 %v3512_v60 }
0x1eeb   :  { %3519 = vrot.lane.b32.xlu0 %v5717_v5, %s5271_s27 }
0x1eef   :  { %3745 = vrot.lane.b32.xlu0 %v5710_v59, %s5272_s28  ;;  %v5808_v61 = vpop.f32.mrf.mxu1 }
0x1ef1   :  { %v5056_v63 = vpop.f32.mrf.mxu1 }
0x1ef3   :  { %3994 = vrot.lane.b32.xlu0 %v5693_v48, %s5275_s3 }
0x1ef7   :  { %3990 = vrot.lane.b32.xlu0 %v5732_v56, %s5276_s4 }
0x1f5e   :  { %v3514_v0 = vpop.xlane.xlu0 %3513 }
0x1f5f   :  { %5200 = vrcp.f32 %v3514_v0 }
0x1f62   :  { %v3520_v1 = vpop.permute.xlu0 %3519 }
0x1f63   :  { %5041 = vmatpush3.msk.msra.mxu0 %vm2358_vm4, %v3520_v1 }
0x1f64   :  { %5042 = vmatprep.subr.mxu0 %v5265_v10 }
0x1f65   :  { %5043 = vmatpush3.msra.mxu0 %v3518_v4 }
0x1f66   :  { %5047 = vmatprep.subr.mxu0 %v5265_v10  ;;  %v3746_v54 = vpop.permute.xlu0 %3745 }
0x1f6a   :  { %v3995_v56 = vpop.permute.xlu0 %3994 }
0x1f6c   :  { %v5201_v59 = vpop.eup %5200 }
0x1f6d   :  { %v3516_v43 = vmul.f32 %v5201_v59, %v5199_v58 }
0x1f6e   :  { %v3991_v14 = vpop.permute.xlu0 %3990 }
0x1f6f   :  { %5045 = vmatmul.mubr.msk.f32.vlgmr.msra.gmra.mxu0 %vm2336_vm3, %v3516_v43 }
0x1f70   :  { %5048 = vmatpush3.msra.mxu0 %v5652_v24  ;;  %5049 = vmatprep.mubr.msk.f32.mxu0 %vm5266_vm1, %v5265_v10  ;;  %v3744_v24 = vpop.permute.xlu1 %3743 }
0x1f71   :  { %5057 = vmatprep.subr.mxu0 %v5265_v10 }
0x1f74   :  { %v3993_v62 = vpop.permute.xlu1 %3992 }
0x202f   :  { %v3593_v48 = vpop.f32.mrf.mxu0 }
0x2030   :  { %5050 = vmatmul.mubr.msk.f32.vlgmr.msra.gmra.mxu0 %vm153_vm2, %v3593_v48 }
0x2031   :  { %5058 = vmatpush3.xpose.msk.msra.mxu0 %vm153_vm2, %v3748_v11  ;;  %v5046_v12 = vpop.f32.mrf.mxu0  ;;  %5061 = vmatprep.mubr.msk.f32.mxu0 %vm5266_vm1, %v5265_v10 }
0x2032   :  { %5059 = vmatprep.subr.mxu0 %v5265_v10 }
0x2035   :  { %5060 = vmatpush3.xpose.msk.msra.mxu0 %vm153_vm2, %v3746_v54 }
0x2036   :  { %5076 = vmatprep.subr.mxu0 %v5265_v10 }
0x2038   :  { %5062 = vmatmul.mubr.msk.f32.vlgmr.msra.gmra.mxu0 %vm153_vm2, %v3744_v24 }
0x2039   :  { %5077 = vmatpush3.xpose.msk.msra.mxu0 %vm153_vm2, %v3995_v56  ;;  %5080 = vmatprep.mubr.msk.f32.mxu0 %vm5266_vm1, %v5265_v10 }
0x203a   :  { %5078 = vmatprep.subr.mxu0 %v5265_v10 }
0x203d   :  { %5079 = vmatpush3.xpose.msk.msra.mxu0 %vm153_vm2, %v3993_v62  ;;  %v4632_v62 = vld [vmem:[#allocation2 + $0xe9] ss:$0 sm:$0xff] }
0x2040   :  { %5081 = vmatmul.mubr.msk.f32.vlgmr.msra.gmra.mxu0 %vm153_vm2, %v3991_v14 }
0x20f0   :  { %v5836_v37 = vpop.f32.mrf.mxu0 }
0x20f1   :  { %v3740_v47 = vadd.f32 %v5808_v61, %v5836_v37 }
0x20f2   :  { %v5051_v41 = vpop.f32.mrf.mxu0 }
0x20f3   :  { %v4288_v41 = vld [vmem:[#allocation2 + $0x98] sm:$0xff] }
0x20f4   :  { %5095 = vmatprep.subr.mxu0 %v4288_v41 }
0x20f5   :  { %5096 = vmatpush3.msra.mxu0 %v4288_v41 }
0x20f8   :  { %v3821_v16 = vpop.f32.mrf.mxu0 }
0x20f9   :  { %v3825_v50 = vsel %vm2336_vm3, %v3821_v16, -inf }
0x20fa   :  { %3826 = vmax.xlane.f32.xlu1 %v3825_v50  ;;  %v5063_v18 = vpop.f32.mrf.mxu0  ;;  %v4286_v50 = vld [vmem:[#allocation2 + $0x88] sm:$0xff] }
0x20fb   :  { %v4285_v18 = vld [vmem:[#allocation2 + $0x80] sm:$0xff] }
0x2100   :  { %v4068_v19 = vpop.f32.mrf.mxu0 }
0x2101   :  { %v4072_v20 = vsel %vm2336_vm3, %v4068_v19, -inf }
0x2102   :  { %v5082_v6 = vpop.f32.mrf.mxu0 }
0x2103   :  { %v4383_v6 = vld [vmem:[#allocation2 + $0xd0] sm:$0xff] }
0x210b   :  { %3836 = vrot.lane.b32.xlu1 %v5724_v9, %s5274_s30 }
0x212f   :  { %4073 = vmax.xlane.f32.xlu1 %v4072_v20  ;;  %v4382_v20 = vld [vmem:[#allocation2 + $0xc8] sm:$0xff] }
0x2140   :  { %4083 = vrot.lane.b32.xlu1 %v5724_v9, %s5277_s5 }
0x2164   :  { %4248 = vadd.xlane.f32.xlu1 %v4247_v26 }
0x2183   :  { %v3827_v27 = vpop.xlane.xlu1 %3826 }
0x2184   :  { %v3828_v29 = vsub.f32 %v3821_v16, %v3827_v27  ;;  %v4287_v16 = vld [vmem:[#allocation2 + $0x90] sm:$0xff] }
0x2185   :  { %5097 = vmatprep.subr.mxu0 %v4287_v16 }
0x2186   :  { %v3829_v30 = vmul.f32 1.442695, %v3828_v29  ;;  %5098 = vmatpush3.msra.mxu0 %v4287_v16 }
0x2187   :  { %v3837_v9 = vpop.permute.xlu1 %3836  ;;  %5099 = vmatprep.subr.mxu0 %v4286_v50 }
0x2188   :  { %5202 = vpow2.f32 %v3829_v30  ;;  %5100 = vmatpush3.msra.mxu0 %v4286_v50 }
0x2189   :  { %5101 = vmatprep.subr.mxu0 %v4285_v18 }
0x218a   :  { %5102 = vmatpush3.msra.mxu0 %v4285_v18 }
0x2195   :  { %v5203_v3 = vpop.eup %5202 }
0x2196   :  { %v3831_v31 = vsel %vm2336_vm3, %v5203_v3, 0.0 }
0x2197   :  { %3832 = vadd.xlane.f32.xlu0 %v3831_v31  ;;  %v4380_v31 = vld [vmem:[#allocation2 + $0xb8] sm:$0xff] }
0x21ad   :  { %3838 = vrot.lane.b32.xlu0 %v5717_v5, %s5274_s30 }
0x21b8   :  { %v4074_v13 = vpop.xlane.xlu1 %4073 }
0x21b9   :  { %v4075_v34 = vsub.f32 %v4068_v19, %v4074_v13  ;;  %v4384_v19 = vld [vmem:[#allocation2 + $0xd8] sm:$0xff]  ;;  %v4378_v13 = vld [vmem:[#allocation2 + $0xa8] sm:$0xff] }
0x21bb   :  { %v4076_v35 = vmul.f32 1.442695, %v4075_v34  ;;  %v4377_v34 = vld [vmem:[#allocation2 + $0xa0] sm:$0xff] }
0x21bc   :  { %v4084_v46 = vpop.permute.xlu1 %4083 }
0x21bd   :  { %5204 = vpow2.f32 %v4076_v35  ;;  %v4633_v35 = vld [vmem:[#allocation2 + $0xe4] ss:$0 sm:$0xff] }
0x21ca   :  { %v5205_v23 = vpop.eup %5204 }
0x21cb   :  { %v4078_v36 = vsel %vm2336_vm3, %v5205_v23, 0.0 }
0x21cc   :  { %4079 = vadd.xlane.f32.xlu0 %v4078_v36 }
0x21e2   :  { %4085 = vrot.lane.b32.xlu0 %v5717_v5, %s5277_s5 }
0x21ed   :  { %v4249_v28 = vpop.xlane.xlu1 %4248 }
0x21ee   :  { %v4253_v53 = vmul.f32 0.03125, %v4249_v28 }
0x21f0   :  { %v4255_v60 = vsub.f32 %v4243_v8, %v4253_v53 }
0x21f2   :  { %v4257_v61 = vmul.f32 %v4255_v60, %v4255_v60 }
0x21f4   :  { %v4259_v0 = vsel %vm52_vm0, %v4257_v61, 0.0 }
0x2220   :  { %v3833_v7 = vpop.xlane.xlu0 %3832 }
0x2221   :  { %5206 = vrcp.f32 %v3833_v7 }
0x2224   :  { %v3839_v40 = vpop.permute.xlu0 %3838 }
0x2225   :  { %5065 = vmatpush3.msk.msra.mxu1 %vm2358_vm4, %v3839_v40 }
0x2226   :  { %5066 = vmatprep.subr.mxu1 %v5265_v10 }
0x2227   :  { %5067 = vmatpush3.msra.mxu1 %v3837_v9  ;;  %v4379_v9 = vld [vmem:[#allocation2 + $0xb0] sm:$0xff] }
0x2228   :  { %5071 = vmatprep.subr.mxu1 %v5265_v10 }
0x222e   :  { %v5207_v32 = vpop.eup %5206 }
0x222f   :  { %v3835_v39 = vmul.f32 %v5207_v32, %v5203_v3 }
0x2231   :  { %5069 = vmatmul.mubr.msk.f32.vlgmr.msra.gmra.mxu1 %vm2336_vm3, %v3835_v39 }
0x2232   :  { %5072 = vmatpush3.msra.mxu1 %v5742_v15  ;;  %5073 = vmatprep.mubr.msk.f32.mxu1 %vm5266_vm1, %v5265_v10 }
0x2233   :  { %5083 = vmatprep.subr.mxu1 %v5265_v10 }
0x2255   :  { %v4080_v5 = vpop.xlane.xlu0 %4079 }
0x2256   :  { %5208 = vrcp.f32 %v4080_v5  ;;  %v4636_v5 = vld [vmem:[#allocation2 + $0xe5] ss:$0 sm:$0xff] }
0x2259   :  { %v4086_v44 = vpop.permute.xlu0 %4085 }
0x2263   :  { %v5209_v38 = vpop.eup %5208 }
0x2264   :  { %v4082_v15 = vmul.f32 %v5209_v38, %v5205_v23 }
0x22f1   :  { %v3912_v42 = vpop.f32.mrf.mxu1 }
0x22f2   :  { %5074 = vmatmul.mubr.msk.f32.vlgmr.msra.gmra.mxu1 %vm153_vm2, %v3912_v42 }
0x22f3   :  { %5084 = vmatpush3.msk.msra.mxu1 %vm2358_vm4, %v4086_v44  ;;  %v5070_v45 = vpop.f32.mrf.mxu1  ;;  %5087 = vmatprep.mubr.msk.f32.mxu1 %vm5266_vm1, %v5265_v10 }
0x22f4   :  { %5085 = vmatprep.subr.mxu1 %v5265_v10 }
0x22f5   :  { %5086 = vmatpush3.msra.mxu1 %v4084_v46 }
0x22f6   :  { %5088 = vmatmul.mubr.msk.f32.vlgmr.msra.gmra.mxu1 %vm2336_vm3, %v4082_v15  ;;  %5090 = vmatprep.subr.mxu1 %v5265_v10 }
0x22f7   :  { %5091 = vmatpush3.msra.mxu1 %v5762_v25  ;;  %5092 = vmatprep.mubr.msk.f32.mxu1 %vm5266_vm1, %v5265_v10 }
0x22f8   :  { %5106 = vmatprep.subr.mxu1 %v4384_v19 }
0x23b2   :  { %v3985_v49 = vpop.f32.mrf.mxu1 }
0x23b3   :  { %v3989_v51 = vadd.f32 %v3985_v49, %v3740_v47 }
0x23b4   :  { %v5075_v17 = vpop.f32.mrf.mxu1 }
0x23b6   :  { %v4159_v52 = vpop.f32.mrf.mxu1 }
0x23b7   :  { %5093 = vmatmul.mubr.msk.f32.vlgmr.msra.gmra.mxu1 %vm153_vm2, %v4159_v52 }
0x23b8   :  { %v5089_v55 = vpop.f32.mrf.mxu1  ;;  %5107 = vmatpush3.msra.mxu1 %v4384_v19 }
0x23b9   :  { %5108 = vmatprep.subr.mxu1 %v4383_v6 }
0x23ba   :  { %5109 = vmatpush3.msra.mxu1 %v4383_v6 }
0x23bb   :  { %5110 = vmatprep.subr.mxu1 %v4382_v20 }
0x23bc   :  { %5111 = vmatpush3.msra.mxu1 %v4382_v20 }
0x2477   :  { %v4232_v57 = vpop.f32.mrf.mxu1 }
0x2478   :  { %v4236_v2 = vadd.f32 %v4232_v57, %v3989_v51 }
0x2479   :  { %v5094_v58 = vpop.f32.mrf.mxu1 }
0x247a   :  { %v4242_v25 = vadd.f32 %v5844_v21, %v4236_v2  ;;  %v4381_v21 = vld [vmem:[#allocation2 + $0xc0] sm:$0xff] }
0x247b   :  { %5112 = vmatprep.subr.mxu1 %v4381_v21 }
0x247c   :  { %v4244_v10 = vadd.f32 %v4242_v25, %v5541_v33  ;;  %v4631_v33 = vld [vmem:[#allocation2 + $0xe8] ss:$0 sm:$0xff]  ;;  %5113 = vmatpush3.msra.mxu1 %v4381_v21 }
0x247d   :  { %5114 = vmatprep.subr.mxu1 %v4380_v31 }
0x247e   :  { %v4250_v63 = vsel %vm52_vm0, %v4244_v10, 0.0  ;;  %5115 = vmatpush3.msra.mxu1 %v4380_v31 }
0x247f   :  { %4251 = vadd.xlane.f32.xlu0 %v4250_v63  ;;  %5116 = vmatprep.subr.mxu1 %v4379_v9 }
0x2480   :  { %5117 = vmatpush3.msra.mxu1 %v4379_v9 }
0x2481   :  { %5118 = vmatprep.subr.mxu1 %v4378_v13 }
0x2482   :  { %5119 = vmatpush3.msra.mxu1 %v4378_v13 }
0x2483   :  { %4260 = vadd.xlane.f32.xlu0 %v4259_v0  ;;  %5120 = vmatprep.subr.mxu1 %v4377_v34 }
0x2484   :  { %5121 = vmatpush3.msra.mxu1 %v4377_v34 }
0x2508   :  { %v4252_v1 = vpop.xlane.xlu0 %4251 }
0x2509   :  { %v4254_v4 = vmul.f32 0.03125, %v4252_v1 }
0x250b   :  { %v4256_v59 = vsub.f32 %v4244_v10, %v4254_v4 }
0x250c   :  { %v4261_v43 = vpop.xlane.xlu0 %4260 }
0x250d   :  { %v4265_v48 = vmul.f32 0.03125, %v4261_v43  ;;  %v4258_v11 = vmul.f32 %v4256_v59, %v4256_v59 }
0x250f   :  { %v4267_v12 = vadd.f32 1e-05, %v4265_v48  ;;  %v4262_v54 = vsel %vm52_vm0, %v4258_v11, 0.0  ;;  %v4640_v11 = vld [vmem:[#allocation2 + $0xeb] ss:$0 sm:$0xff] }
0x2510   :  { %4263 = vadd.xlane.f32.xlu1 %v4262_v54 }
0x2511   :  { %5210 = vrsqrt.f32 %v4267_v12 }
0x251e   :  { %v5211_v24 = vpop.eup %5210 }
0x251f   :  { %v4271_v56 = vmul.f32 %v5211_v24, %v4255_v60 }
0x2521   :  { %v4277_v14 = vmul.f32 %v4631_v33, %v4271_v56 }
0x2523   :  { %v5882_v37 = vadd.f32 %v4632_v62, %v4277_v14 }
0x2525   :  { %5103 = vmatprep.mubr.msk.f32.mxu0 %vm52_vm0, %v5882_v37 }
0x2599   :  { %v4264_v22 = vpop.xlane.xlu1 %4263 }
0x259a   :  { %v4266_v8 = vmul.f32 0.03125, %v4264_v22 }
0x259c   :  { %v4268_v26 = vadd.f32 1e-05, %v4266_v8 }
0x259e   :  { %5212 = vrsqrt.f32 %v4268_v26 }
0x25ab   :  { %v5213_v27 = vpop.eup %5212 }
0x25ac   :  { %v4272_v29 = vmul.f32 %v5213_v27, %v4256_v59  ;;  %v4639_v59 = vld [vmem:[#allocation2 + $0xea] ss:$0 sm:$0xff] }
0x25ae   :  { %v4278_v30 = vmul.f32 %v4631_v33, %v4272_v29 }
0x25b0   :  { %v4284_v3 = vadd.f32 %v4632_v62, %v4278_v30 }
0x25b2   :  { %5104 = vmatmul.mubr.msk.f32.vlgmr.msra.gmra.mxu0 %vm52_vm0, %v4284_v3 }
0x2672   :  { %v5105_v23 = vpop.f32.mrf.mxu0 }
0x2673   :  { %v4372_v36 = vadd.f32 %v5105_v23, %v4633_v35 }
0x2674   :  { %v4366_v7 = vpop.f32.mrf.mxu0 }
0x2675   :  { %v4367_v40 = vadd.f32 %v4633_v35, %v4366_v7  ;;  %v4376_v39 = vmax.f32 %v4372_v36, 0.0 }
0x2677   :  { %v4375_v32 = vmax.f32 %v4367_v40, 0.0 }
0x2679   :  { %5122 = vmatprep.mubr.msk.f32.mxu1 %vm4390_vm5, %v4375_v32 }
0x267a   :  { %5123 = vmatmul.mubr.msk.f32.vlgmr.msra.gmra.mxu1 %vm4390_vm5, %v4376_v39 }
0x273a   :  { %v5124_v38 = vpop.f32.mrf.mxu1 }
0x273b   :  { %v4469_v42 = vadd.f32 %v5124_v38, %v4636_v5 }
0x273c   :  { %v4463_v44 = vpop.f32.mrf.mxu1 }
0x273d   :  { %v4464_v45 = vadd.f32 %v4636_v5, %v4463_v44  ;;  %v4473_v46 = vadd.f32 %v4469_v42, %v4284_v3 }
0x273f   :  { %v4472_v15 = vadd.f32 %v4464_v45, %v5882_v37  ;;  %v4479_v47 = vsel %vm52_vm0, %v4473_v46, 0.0 }
0x2740   :  { %4480 = vadd.xlane.f32.xlu1 %v4479_v47 }
0x2741   :  { %v4476_v49 = vsel %vm52_vm0, %v4472_v15, 0.0 }
0x2742   :  { %4477 = vadd.xlane.f32.xlu0 %v4476_v49 }
0x27c9   :  { %v4481_v51 = vpop.xlane.xlu1 %4480 }
0x27ca   :  { %v4483_v17 = vmul.f32 0.03125, %v4481_v51 }
0x27cb   :  { %v4478_v52 = vpop.xlane.xlu0 %4477 }
0x27cc   :  { %v4485_v55 = vsub.f32 %v4473_v46, %v4483_v17  ;;  %v4482_v28 = vmul.f32 0.03125, %v4478_v52 }
0x27ce   :  { %v4484_v53 = vsub.f32 %v4472_v15, %v4482_v28  ;;  %v4487_v57 = vmul.f32 %v4485_v55, %v4485_v55 }
0x27d0   :  { %v4491_v2 = vsel %vm52_vm0, %v4487_v57, 0.0  ;;  %v4486_v58 = vmul.f32 %v4484_v53, %v4484_v53 }
0x27d1   :  { %4492 = vadd.xlane.f32.xlu1 %v4491_v2 }
0x27d2   :  { %v4488_v60 = vsel %vm52_vm0, %v4486_v58, 0.0 }
0x27d3   :  { %4489 = vadd.xlane.f32.xlu0 %v4488_v60 }
0x285a   :  { %v4493_v25 = vpop.xlane.xlu1 %4492 }
0x285b   :  { %v4495_v10 = vmul.f32 0.03125, %v4493_v25 }
0x285c   :  { %v4490_v63 = vpop.xlane.xlu0 %4489 }
0x285d   :  { %v4497_v61 = vadd.f32 1e-05, %v4495_v10  ;;  %v4494_v0 = vmul.f32 0.03125, %v4490_v63 }
0x285f   :  { %5214 = vrsqrt.f32 %v4497_v61  ;;  %v4496_v1 = vadd.f32 1e-05, %v4494_v0 }
0x2861   :  { %5216 = vrsqrt.f32 %v4496_v1 }
0x286c   :  { %v5215_v4 = vpop.eup %5214 }
0x286d   :  { %v4501_v43 = vmul.f32 %v5215_v4, %v4485_v55 }
0x286e   :  { %v5217_v48 = vpop.eup %5216 }
0x286f   :  { %v4500_v12 = vmul.f32 %v5217_v48, %v4484_v53  ;;  %v4507_v54 = vmul.f32 %v4639_v59, %v4501_v43 }
0x2871   :  { %v4506_v24 = vmul.f32 %v4639_v59, %v4500_v12  ;;  %v4513_v33 = vadd.f32 %v4640_v11, %v4507_v54 }
0x2873   :  { %v4512_v56 = vadd.f32 %v4640_v11, %v4506_v24  ;;  %4515 = vst.msk [vmem:[#allocation5 + $0x8] sm:$0xff] %vm52_vm0, %v4513_v33 }
0x2875   :  { %4514 = vst.msk [vmem:[#allocation5] sm:$0xff] %vm52_vm0, %v4512_v56 }
0x2876   :  { %5249 = shalt.err (!%p5246_p9)
}
0x2877   :  { %4527 = dma.vmem_to_hbm [thread:$0]  %s4522_s1, 256, %s5902_s2, [#allocation4], %s5263_s12, %s5263_s12, %s5264_s13  }
0x2878   :  { %5260 = dma.done.wait [#allocation4], 256  }
0x2879   :  { %5261 = vsyncadd [#allocation4], 4294967040 }
0x287a   :  { %4531 = vsyncpa [#allocation3], 1 }
0x287b   :  { %4532 = vsyncpa [#allocation4], 1 }

</bundles_post_ra>
